<compile_context>
chip_gen: v7x
topology: tpu7x:2x2x1
jax: 0.10.0
libtpu: 0.0.40
codegen_flags: <defaults>
</compile_context>

<pallas_src>
import functools
import math

import jax
import jax.numpy as jnp
from jax.experimental import pallas as pl
from jax.experimental.pallas import tpu as pltpu


# ----------------------------------------------------------------------------
# Pallas kernels
# ----------------------------------------------------------------------------

def _matmul_bias_act_kernel(p_ref, w_ref, b_ref, o_ref, *, act):
    """o = act(W @ patches + b) for one image.

    p_ref: (Q, P)    im2col patches, Q = Cin*k*k, P = Ho*Wo (lane-dense)
    w_ref: (Cout, Q) reshaped conv weight
    b_ref: (Cout, 1) bias
    o_ref: (Cout, P)
    """
    acc = jnp.dot(w_ref[...], p_ref[...], preferred_element_type=jnp.float32)
    acc = acc + b_ref[...]                     # (Cout, P) + (Cout, 1) broadcast
    if act == "relu":
        acc = jnp.maximum(acc, 0.0)
    elif act == "tanh":
        acc = jnp.tanh(acc)                    # EUP
    o_ref[...] = acc.astype(o_ref.dtype)


def _maxpool_kernel(x_ref, o_ref):
    """x_ref: (k*k, C, P) shifted window views; o_ref: (C, P) window max."""
    acc = x_ref[0]
    for i in range(1, x_ref.shape[0]):         # static unroll (k*k = 4)
        acc = jnp.maximum(acc, x_ref[i])
    o_ref[...] = acc


# ----------------------------------------------------------------------------
# Layer wrappers (layout in XLA, all FLOPs in Pallas)
# ----------------------------------------------------------------------------

def _im2col(x, k, stride, padding):
    """x: (B, C, H, W) -> patches (B, C*k*k, Ho*Wo); q index = ci*k*k + di*k + dj,
    matching w.reshape(Cout, Cin*k*k)."""
    B, C, H, W = x.shape
    xp = jnp.pad(x, ((0, 0), (0, 0), (padding, padding), (padding, padding)))
    Ho = (H + 2 * padding - k) // stride + 1
    Wo = (W + 2 * padding - k) // stride + 1
    cols = []
    for di in range(k):
        for dj in range(k):
            cols.append(jax.lax.slice(
                xp,
                (0, 0, di, dj),
                (B, C, di + stride * (Ho - 1) + 1, dj + stride * (Wo - 1) + 1),
                (1, 1, stride, stride)))       # (B, C, Ho, Wo)
    patches = jnp.stack(cols, axis=2)          # (B, C, k*k, Ho, Wo)
    patches = patches.reshape(B, C * k * k, Ho * Wo)
    return patches, Ho, Wo


def conv2d_pallas(x, w, b, *, stride, padding, act):
    """PyTorch-style Conv2d(+bias)+activation. x:(B,Cin,H,W), w:(Cout,Cin,k,k)."""
    B = x.shape[0]
    Cout, Cin, k, _ = w.shape
    patches, Ho, Wo = _im2col(x.astype(jnp.float32), k, stride, padding)
    Q, P = Cin * k * k, Ho * Wo
    w2 = w.reshape(Cout, Q).astype(jnp.float32)
    b2 = b.reshape(Cout, 1).astype(jnp.float32)

    out = pl.pallas_call(
        functools.partial(_matmul_bias_act_kernel, act=act),
        out_shape=jax.ShapeDtypeStruct((B, Cout, P), jnp.float32),
        grid=(B,),
        in_specs=[
            pl.BlockSpec((None, Q, P), lambda bb: (bb, 0, 0)),
            pl.BlockSpec((Cout, Q), lambda bb: (0, 0)),
            pl.BlockSpec((Cout, 1), lambda bb: (0, 0)),
        ],
        out_specs=pl.BlockSpec((None, Cout, P), lambda bb: (bb, 0, 0)),
        compiler_params=pltpu.CompilerParams(
            dimension_semantics=("parallel",)),
    )(patches, w2, b2)
    return out.reshape(B, Cout, Ho, Wo)


def conv_transpose2d_pallas(x, w, b, *, stride, padding, act):
    """PyTorch-style ConvTranspose2d. x:(B,Cin,H,W), w:(Cin,Cout,k,k).
    Rewritten as a stride-1 conv over the zero-dilated, (k-1-p)-padded input
    with spatially flipped, channel-swapped weights."""
    B, Cin, H, W = x.shape
    _, Cout, k, _ = w.shape
    Hd, Wd = (H - 1) * stride + 1, (W - 1) * stride + 1
    xd = jnp.zeros((B, Cin, Hd, Wd), jnp.float32)
    xd = xd.at[:, :, ::stride, ::stride].set(x.astype(jnp.float32))
    wc = jnp.flip(w, axis=(2, 3)).transpose(1, 0, 2, 3)   # (Cout, Cin, k, k)
    return conv2d_pallas(xd, wc, b, stride=1, padding=k - 1 - padding, act=act)


def maxpool2d_pallas(x, *, k, stride):
    B, C, H, W = x.shape
    Ho = (H - k) // stride + 1
    Wo = (W - k) // stride + 1
    views = []
    for di in range(k):
        for dj in range(k):
            v = jax.lax.slice(
                x,
                (0, 0, di, dj),
                (B, C, di + stride * (Ho - 1) + 1, dj + stride * (Wo - 1) + 1),
                (1, 1, stride, stride))        # (B, C, Ho, Wo)
            views.append(v.reshape(B, C, Ho * Wo))
    stacked = jnp.stack(views, axis=1)         # (B, k*k, C, Ho*Wo)
    KK, P = k * k, Ho * Wo

    out = pl.pallas_call(
        _maxpool_kernel,
        out_shape=jax.ShapeDtypeStruct((B, C, P), jnp.float32),
        grid=(B,),
        in_specs=[pl.BlockSpec((None, KK, C, P), lambda bb: (bb, 0, 0, 0))],
        out_specs=pl.BlockSpec((None, C, P), lambda bb: (bb, 0, 0)),
        compiler_params=pltpu.CompilerParams(
            dimension_semantics=("parallel",)),
    )(stacked)
    return out.reshape(B, C, Ho, Wo)


# ----------------------------------------------------------------------------
# ConvAE forward (Pallas) + parameter init
# ----------------------------------------------------------------------------

def convae_forward(params, x):
    h = conv2d_pallas(x, params["ec1_w"], params["ec1_b"],
                      stride=3, padding=1, act="relu")
    h = maxpool2d_pallas(h, k=2, stride=2)
    h = conv2d_pallas(h, params["ec2_w"], params["ec2_b"],
                      stride=2, padding=1, act="relu")
    h = maxpool2d_pallas(h, k=2, stride=1)
    h = conv_transpose2d_pallas(h, params["dt1_w"], params["dt1_b"],
                                stride=2, padding=0, act="relu")
    h = conv_transpose2d_pallas(h, params["dt2_w"], params["dt2_b"],
                                stride=3, padding=1, act="relu")
    h = conv_transpose2d_pallas(h, params["dt3_w"], params["dt3_b"],
                                stride=2, padding=1, act="tanh")
    return h


def init_convae_params(key):
    def conv_init(k_, cout, cin, ksz):
        kw, kb = jax.random.split(k_)
        bound = 1.0 / math.sqrt(cin * ksz * ksz)
        w = jax.random.uniform(kw, (cout, cin, ksz, ksz), jnp.float32, -bound, bound)
        b = jax.random.uniform(kb, (cout,), jnp.float32, -bound, bound)
        return w, b

    def convt_init(k_, cin, cout, ksz):
        kw, kb = jax.random.split(k_)
        bound = 1.0 / math.sqrt(cout * ksz * ksz)   # PyTorch fan_in convention
        w = jax.random.uniform(kw, (cin, cout, ksz, ksz), jnp.float32, -bound, bound)
        b = jax.random.uniform(kb, (cout,), jnp.float32, -bound, bound)
        return w, b

    k1, k2, k3, k4, k5 = jax.random.split(key, 5)
    p = {}
    p["ec1_w"], p["ec1_b"] = conv_init(k1, 16, 1, 3)
    p["ec2_w"], p["ec2_b"] = conv_init(k2, 8, 16, 3)
    p["dt1_w"], p["dt1_b"] = convt_init(k3, 8, 16, 3)
    p["dt2_w"], p["dt2_b"] = convt_init(k4, 16, 8, 5)
    p["dt3_w"], p["dt3_b"] = convt_init(k5, 8, 1, 2)
    return p


# ----------------------------------------------------------------------------
# Pure-JAX reference (independent of the Pallas path)
# ----------------------------------------------------------------------------

def _conv_ref(x, w, b, stride, padding):
    out = jax.lax.conv_general_dilated(
        x, w, window_strides=(stride, stride),
        padding=((padding, padding), (padding, padding)),
        dimension_numbers=("NCHW", "OIHW", "NCHW"),
        precision=jax.lax.Precision.HIGHEST)
    return out + b.reshape(1, -1, 1, 1)


def _convt_ref(x, w, b, stride, padding):
    k = w.shape[2]
    wc = jnp.flip(w, axis=(2, 3)).transpose(1, 0, 2, 3)
    out = jax.lax.conv_general_dilated(
        x, wc, window_strides=(1, 1),
        padding=((k - 1 - padding,) * 2,) * 2,
        lhs_dilation=(stride, stride),
        dimension_numbers=("NCHW", "OIHW", "NCHW"),
        precision=jax.lax.Precision.HIGHEST)
    return out + b.reshape(1, -1, 1, 1)


def _maxpool_ref(x, k, stride):
    return jax.lax.reduce_window(
        x, -jnp.inf, jax.lax.max, (1, 1, k, k), (1, 1, stride, stride), "VALID")


def convae_reference(params, x):
    h = jnp.maximum(_conv_ref(x, params["ec1_w"], params["ec1_b"], 3, 1), 0.0)
    h = _maxpool_ref(h, 2, 2)
    h = jnp.maximum(_conv_ref(h, params["ec2_w"], params["ec2_b"], 2, 1), 0.0)
    h = _maxpool_ref(h, 2, 1)
    h = jnp.maximum(_convt_ref(h, params["dt1_w"], params["dt1_b"], 2, 0), 0.0)
    h = jnp.maximum(_convt_ref(h, params["dt2_w"], params["dt2_b"], 3, 1), 0.0)
    h = jnp.tanh(_convt_ref(h, params["dt3_w"], params["dt3_b"], 2, 1))
    return h


if __name__ == "__main__":
    key = jax.random.PRNGKey(0)
    kp, kx = jax.random.split(key)
    params = init_convae_params(kp)

    B = 2
    x = jax.random.normal(kx, (B, 1, 28, 28), dtype=jnp.float32)

    out = jax.block_until_ready(jax.jit(convae_forward)(params, x))
    ref = jax.block_until_ready(jax.jit(convae_reference)(params, x))

    assert out.shape == (B, 1, 28, 28), out.shape
    max_err = float(jnp.max(jnp.abs(out - ref)))
    assert jnp.allclose(out, ref, atol=2e-2, rtol=2e-2), max_err
    print("KERNEL_OK")
</pallas_src>

<mosaic_0001>
module attributes {stable_mosaic.version = 11 : i64} {
  func.func @_matmul_bias_act_kernel(%arg0: i32, %arg1: memref<1x9x100xf32, #tpu.memory_space<vmem>>, %arg2: memref<16x9xf32, #tpu.memory_space<vmem>>, %arg3: memref<16x1xf32, #tpu.memory_space<vmem>>, %arg4: memref<1x16x100xf32, #tpu.memory_space<vmem>>) attributes {dimension_semantics = [#tpu.dimension_semantics<parallel>], iteration_bounds = array<i64: 2>, scalar_prefetch = 0 : i64, scratch_operands = 0 : i64, tpu.core_type = #tpu.core_type<tc>, window_params = [{transform_indices = @transform_0, window_bounds = array<i64: 1, 9, 100>}, {pipeline_mode = #tpu.pipeline_mode<synchronous>, transform_indices = @transform_1, window_bounds = array<i64: 16, 9>}, {pipeline_mode = #tpu.pipeline_mode<synchronous>, transform_indices = @transform_2, window_bounds = array<i64: 16, 1>}, {transform_indices = @transform_3, window_bounds = array<i64: 1, 16, 100>}]} {
    %c0 = arith.constant 0 : index
    %c0_0 = arith.constant 0 : index
    %0 = vector.load %arg2[%c0, %c0_0] : memref<16x9xf32, #tpu.memory_space<vmem>>, vector<16x9xf32>
    %c0_1 = arith.constant 0 : index
    %c0_2 = arith.constant 0 : index
    %c0_3 = arith.constant 0 : index
    %1 = vector.load %arg1[%c0_1, %c0_2, %c0_3] : memref<1x9x100xf32, #tpu.memory_space<vmem>>, vector<1x9x100xf32>
    %2 = vector.shape_cast %1 : vector<1x9x100xf32> to vector<9x100xf32>
    %cst = arith.constant dense<0.000000e+00> : vector<16x100xf32>
    %3 = tpu.matmul %0, %2, %cst {dimension_numbers = #tpu.dot_dimension_numbers<[1], [0], [0], [1], [0, 0, 1, 1], [], []>} : vector<16x9xf32>, vector<9x100xf32>, vector<16x100xf32> -> vector<16x100xf32>
    %c0_4 = arith.constant 0 : index
    %c0_5 = arith.constant 0 : index
    %4 = vector.load %arg3[%c0_4, %c0_5] : memref<16x1xf32, #tpu.memory_space<vmem>>, vector<16x1xf32>
    %5 = vector.broadcast %4 : vector<16x1xf32> to vector<16x100xf32>
    %6 = arith.addf %3, %5 : vector<16x100xf32>
    %cst_6 = arith.constant 0.000000e+00 : f32
    %7 = vector.broadcast %cst_6 : f32 to vector<16x100xf32>
    %8 = arith.maximumf %6, %7 : vector<16x100xf32>
    %c0_7 = arith.constant 0 : index
    %c0_8 = arith.constant 0 : index
    %c0_9 = arith.constant 0 : index
    %9 = vector.load %arg4[%c0_7, %c0_8, %c0_9] : memref<1x16x100xf32, #tpu.memory_space<vmem>>, vector<1x16x100xf32>
    %10 = vector.shape_cast %9 : vector<1x16x100xf32> to vector<16x100xf32>
    %11 = vector.shape_cast %8 : vector<16x100xf32> to vector<1x16x100xf32>
    tpu.vector_store %arg4[%c0_7, %c0_8, %c0_9], %11 {strides = array<i32>} : memref<1x16x100xf32, #tpu.memory_space<vmem>>, vector<1x16x100xf32>,
    return
  }
  func.func @transform_0(%arg0: i32) -> (i32, i32, i32) {
    %c0_i32 = arith.constant 0 : i32
    %c0_i32_0 = arith.constant 0 : i32
    %c0_i32_1 = arith.constant 0 : i32
    return %arg0, %c0_i32, %c0_i32_0 : i32, i32, i32
  }
  func.func @transform_1(%arg0: i32) -> (i32, i32) {
    %c0_i32 = arith.constant 0 : i32
    %c0_i32_0 = arith.constant 0 : i32
    %c0_i32_1 = arith.constant 0 : i32
    return %c0_i32, %c0_i32_0 : i32, i32
  }
  func.func @transform_2(%arg0: i32) -> (i32, i32) {
    %c0_i32 = arith.constant 0 : i32
    %c0_i32_0 = arith.constant 0 : i32
    %c0_i32_1 = arith.constant 0 : i32
    return %c0_i32, %c0_i32_0 : i32, i32
  }
  func.func @transform_3(%arg0: i32) -> (i32, i32, i32) {
    %c0_i32 = arith.constant 0 : i32
    %c0_i32_0 = arith.constant 0 : i32
    %c0_i32_1 = arith.constant 0 : i32
    return %arg0, %c0_i32, %c0_i32_0 : i32, i32, i32
  }
}

module attributes {stable_mosaic.version = 11 : i64} {
  func.func @_maxpool_kernel(%arg0: i32, %arg1: memref<1x4x16x25xf32, #tpu.memory_space<vmem>>, %arg2: memref<1x16x25xf32, #tpu.memory_space<vmem>>) attributes {dimension_semantics = [#tpu.dimension_semantics<parallel>], iteration_bounds = array<i64: 2>, scalar_prefetch = 0 : i64, scratch_operands = 0 : i64, tpu.core_type = #tpu.core_type<tc>, window_params = [{transform_indices = @transform_0, window_bounds = array<i64: 1, 4, 16, 25>}, {transform_indices = @transform_1, window_bounds = array<i64: 1, 16, 25>}]} {
    %c0 = arith.constant 0 : index
    %c0_0 = arith.constant 0 : index
    %c0_1 = arith.constant 0 : index
    %c0_2 = arith.constant 0 : index
    %0 = vector.load %arg1[%c0, %c0_0, %c0_1, %c0_2] : memref<1x4x16x25xf32, #tpu.memory_space<vmem>>, vector<1x1x16x25xf32>
    %1 = vector.shape_cast %0 : vector<1x1x16x25xf32> to vector<16x25xf32>
    %c0_3 = arith.constant 0 : index
    %c1 = arith.constant 1 : index
    %c0_4 = arith.constant 0 : index
    %c0_5 = arith.constant 0 : index
    %2 = vector.load %arg1[%c0_3, %c1, %c0_4, %c0_5] : memref<1x4x16x25xf32, #tpu.memory_space<vmem>>, vector<1x1x16x25xf32>
    %3 = vector.shape_cast %2 : vector<1x1x16x25xf32> to vector<16x25xf32>
    %4 = arith.maximumf %1, %3 : vector<16x25xf32>
    %c0_6 = arith.constant 0 : index
    %c2 = arith.constant 2 : index
    %c0_7 = arith.constant 0 : index
    %c0_8 = arith.constant 0 : index
    %5 = vector.load %arg1[%c0_6, %c2, %c0_7, %c0_8] : memref<1x4x16x25xf32, #tpu.memory_space<vmem>>, vector<1x1x16x25xf32>
    %6 = vector.shape_cast %5 : vector<1x1x16x25xf32> to vector<16x25xf32>
    %7 = arith.maximumf %4, %6 : vector<16x25xf32>
    %c0_9 = arith.constant 0 : index
    %c3 = arith.constant 3 : index
    %c0_10 = arith.constant 0 : index
    %c0_11 = arith.constant 0 : index
    %8 = vector.load %arg1[%c0_9, %c3, %c0_10, %c0_11] : memref<1x4x16x25xf32, #tpu.memory_space<vmem>>, vector<1x1x16x25xf32>
    %9 = vector.shape_cast %8 : vector<1x1x16x25xf32> to vector<16x25xf32>
    %10 = arith.maximumf %7, %9 : vector<16x25xf32>
    %c0_12 = arith.constant 0 : index
    %c0_13 = arith.constant 0 : index
    %c0_14 = arith.constant 0 : index
    %11 = vector.load %arg2[%c0_12, %c0_13, %c0_14] : memref<1x16x25xf32, #tpu.memory_space<vmem>>, vector<1x16x25xf32>
    %12 = vector.shape_cast %11 : vector<1x16x25xf32> to vector<16x25xf32>
    %13 = vector.shape_cast %10 : vector<16x25xf32> to vector<1x16x25xf32>
    tpu.vector_store %arg2[%c0_12, %c0_13, %c0_14], %13 {strides = array<i32>} : memref<1x16x25xf32, #tpu.memory_space<vmem>>, vector<1x16x25xf32>,
    return
  }
  func.func @transform_0(%arg0: i32) -> (i32, i32, i32, i32) {
    %c0_i32 = arith.constant 0 : i32
    %c0_i32_0 = arith.constant 0 : i32
    %c0_i32_1 = arith.constant 0 : i32
    %c0_i32_2 = arith.constant 0 : i32
    return %arg0, %c0_i32, %c0_i32_0, %c0_i32_1 : i32, i32, i32, i32
  }
  func.func @transform_1(%arg0: i32) -> (i32, i32, i32) {
    %c0_i32 = arith.constant 0 : i32
    %c0_i32_0 = arith.constant 0 : i32
    %c0_i32_1 = arith.constant 0 : i32
    return %arg0, %c0_i32, %c0_i32_0 : i32, i32, i32
  }
}

module attributes {stable_mosaic.version = 11 : i64} {
  func.func @_maxpool_kernel(%arg0: i32, %arg1: memref<1x4x8x4xf32, #tpu.memory_space<vmem>>, %arg2: memref<1x8x4xf32, #tpu.memory_space<vmem>>) attributes {dimension_semantics = [#tpu.dimension_semantics<parallel>], iteration_bounds = array<i64: 2>, scalar_prefetch = 0 : i64, scratch_operands = 0 : i64, tpu.core_type = #tpu.core_type<tc>, window_params = [{transform_indices = @transform_0, window_bounds = array<i64: 1, 4, 8, 4>}, {transform_indices = @transform_1, window_bounds = array<i64: 1, 8, 4>}]} {
    %c0 = arith.constant 0 : index
    %c0_0 = arith.constant 0 : index
    %c0_1 = arith.constant 0 : index
    %c0_2 = arith.constant 0 : index
    %0 = vector.load %arg1[%c0, %c0_0, %c0_1, %c0_2] : memref<1x4x8x4xf32, #tpu.memory_space<vmem>>, vector<1x1x8x4xf32>
    %1 = vector.shape_cast %0 : vector<1x1x8x4xf32> to vector<8x4xf32>
    %c0_3 = arith.constant 0 : index
    %c1 = arith.constant 1 : index
    %c0_4 = arith.constant 0 : index
    %c0_5 = arith.constant 0 : index
    %2 = vector.load %arg1[%c0_3, %c1, %c0_4, %c0_5] : memref<1x4x8x4xf32, #tpu.memory_space<vmem>>, vector<1x1x8x4xf32>
    %3 = vector.shape_cast %2 : vector<1x1x8x4xf32> to vector<8x4xf32>
    %4 = arith.maximumf %1, %3 : vector<8x4xf32>
    %c0_6 = arith.constant 0 : index
    %c2 = arith.constant 2 : index
    %c0_7 = arith.constant 0 : index
    %c0_8 = arith.constant 0 : index
    %5 = vector.load %arg1[%c0_6, %c2, %c0_7, %c0_8] : memref<1x4x8x4xf32, #tpu.memory_space<vmem>>, vector<1x1x8x4xf32>
    %6 = vector.shape_cast %5 : vector<1x1x8x4xf32> to vector<8x4xf32>
    %7 = arith.maximumf %4, %6 : vector<8x4xf32>
    %c0_9 = arith.constant 0 : index
    %c3 = arith.constant 3 : index
    %c0_10 = arith.constant 0 : index
    %c0_11 = arith.constant 0 : index
    %8 = vector.load %arg1[%c0_9, %c3, %c0_10, %c0_11] : memref<1x4x8x4xf32, #tpu.memory_space<vmem>>, vector<1x1x8x4xf32>
    %9 = vector.shape_cast %8 : vector<1x1x8x4xf32> to vector<8x4xf32>
    %10 = arith.maximumf %7, %9 : vector<8x4xf32>
    %c0_12 = arith.constant 0 : index
    %c0_13 = arith.constant 0 : index
    %c0_14 = arith.constant 0 : index
    %11 = vector.load %arg2[%c0_12, %c0_13, %c0_14] : memref<1x8x4xf32, #tpu.memory_space<vmem>>, vector<1x8x4xf32>
    %12 = vector.shape_cast %11 : vector<1x8x4xf32> to vector<8x4xf32>
    %13 = vector.shape_cast %10 : vector<8x4xf32> to vector<1x8x4xf32>
    tpu.vector_store %arg2[%c0_12, %c0_13, %c0_14], %13 {strides = array<i32>} : memref<1x8x4xf32, #tpu.memory_space<vmem>>, vector<1x8x4xf32>,
    return
  }
  func.func @transform_0(%arg0: i32) -> (i32, i32, i32, i32) {
    %c0_i32 = arith.constant 0 : i32
    %c0_i32_0 = arith.constant 0 : i32
    %c0_i32_1 = arith.constant 0 : i32
    %c0_i32_2 = arith.constant 0 : i32
    return %arg0, %c0_i32, %c0_i32_0, %c0_i32_1 : i32, i32, i32, i32
  }
  func.func @transform_1(%arg0: i32) -> (i32, i32, i32) {
    %c0_i32 = arith.constant 0 : i32
    %c0_i32_0 = arith.constant 0 : i32
    %c0_i32_1 = arith.constant 0 : i32
    return %arg0, %c0_i32, %c0_i32_0 : i32, i32, i32
  }
}

module attributes {stable_mosaic.version = 11 : i64} {
  func.func @_matmul_bias_act_kernel(%arg0: i32, %arg1: memref<1x144x9xf32, #tpu.memory_space<vmem>>, %arg2: memref<8x144xf32, #tpu.memory_space<vmem>>, %arg3: memref<8x1xf32, #tpu.memory_space<vmem>>, %arg4: memref<1x8x9xf32, #tpu.memory_space<vmem>>) attributes {dimension_semantics = [#tpu.dimension_semantics<parallel>], iteration_bounds = array<i64: 2>, scalar_prefetch = 0 : i64, scratch_operands = 0 : i64, tpu.core_type = #tpu.core_type<tc>, window_params = [{transform_indices = @transform_0, window_bounds = array<i64: 1, 144, 9>}, {pipeline_mode = #tpu.pipeline_mode<synchronous>, transform_indices = @transform_1, window_bounds = array<i64: 8, 144>}, {pipeline_mode = #tpu.pipeline_mode<synchronous>, transform_indices = @transform_2, window_bounds = array<i64: 8, 1>}, {transform_indices = @transform_3, window_bounds = array<i64: 1, 8, 9>}]} {
    %c0 = arith.constant 0 : index
    %c0_0 = arith.constant 0 : index
    %0 = vector.load %arg2[%c0, %c0_0] : memref<8x144xf32, #tpu.memory_space<vmem>>, vector<8x144xf32>
    %c0_1 = arith.constant 0 : index
    %c0_2 = arith.constant 0 : index
    %c0_3 = arith.constant 0 : index
    %1 = vector.load %arg1[%c0_1, %c0_2, %c0_3] : memref<1x144x9xf32, #tpu.memory_space<vmem>>, vector<1x144x9xf32>
    %2 = vector.shape_cast %1 : vector<1x144x9xf32> to vector<144x9xf32>
    %cst = arith.constant dense<0.000000e+00> : vector<8x9xf32>
    %3 = tpu.matmul %0, %2, %cst {dimension_numbers = #tpu.dot_dimension_numbers<[1], [0], [0], [1], [0, 0, 1, 1], [], []>} : vector<8x144xf32>, vector<144x9xf32>, vector<8x9xf32> -> vector<8x9xf32>
    %c0_4 = arith.constant 0 : index
    %c0_5 = arith.constant 0 : index
    %4 = vector.load %arg3[%c0_4, %c0_5] : memref<8x1xf32, #tpu.memory_space<vmem>>, vector<8x1xf32>
    %5 = vector.broadcast %4 : vector<8x1xf32> to vector<8x9xf32>
    %6 = arith.addf %3, %5 : vector<8x9xf32>
    %cst_6 = arith.constant 0.000000e+00 : f32
    %7 = vector.broadcast %cst_6 : f32 to vector<8x9xf32>
    %8 = arith.maximumf %6, %7 : vector<8x9xf32>
    %c0_7 = arith.constant 0 : index
    %c0_8 = arith.constant 0 : index
    %c0_9 = arith.constant 0 : index
    %9 = vector.load %arg4[%c0_7, %c0_8, %c0_9] : memref<1x8x9xf32, #tpu.memory_space<vmem>>, vector<1x8x9xf32>
    %10 = vector.shape_cast %9 : vector<1x8x9xf32> to vector<8x9xf32>
    %11 = vector.shape_cast %8 : vector<8x9xf32> to vector<1x8x9xf32>
    tpu.vector_store %arg4[%c0_7, %c0_8, %c0_9], %11 {strides = array<i32>} : memref<1x8x9xf32, #tpu.memory_space<vmem>>, vector<1x8x9xf32>,
    return
  }
  func.func @transform_0(%arg0: i32) -> (i32, i32, i32) {
    %c0_i32 = arith.constant 0 : i32
    %c0_i32_0 = arith.constant 0 : i32
    %c0_i32_1 = arith.constant 0 : i32
    return %arg0, %c0_i32, %c0_i32_0 : i32, i32, i32
  }
  func.func @transform_1(%arg0: i32) -> (i32, i32) {
    %c0_i32 = arith.constant 0 : i32
    %c0_i32_0 = arith.constant 0 : i32
    %c0_i32_1 = arith.constant 0 : i32
    return %c0_i32, %c0_i32_0 : i32, i32
  }
  func.func @transform_2(%arg0: i32) -> (i32, i32) {
    %c0_i32 = arith.constant 0 : i32
    %c0_i32_0 = arith.constant 0 : i32
    %c0_i32_1 = arith.constant 0 : i32
    return %c0_i32, %c0_i32_0 : i32, i32
  }
  func.func @transform_3(%arg0: i32) -> (i32, i32, i32) {
    %c0_i32 = arith.constant 0 : i32
    %c0_i32_0 = arith.constant 0 : i32
    %c0_i32_1 = arith.constant 0 : i32
    return %arg0, %c0_i32, %c0_i32_0 : i32, i32, i32
  }
}

module attributes {stable_mosaic.version = 11 : i64} {
  func.func @_matmul_bias_act_kernel(%arg0: i32, %arg1: memref<1x72x25xf32, #tpu.memory_space<vmem>>, %arg2: memref<16x72xf32, #tpu.memory_space<vmem>>, %arg3: memref<16x1xf32, #tpu.memory_space<vmem>>, %arg4: memref<1x16x25xf32, #tpu.memory_space<vmem>>) attributes {dimension_semantics = [#tpu.dimension_semantics<parallel>], iteration_bounds = array<i64: 2>, scalar_prefetch = 0 : i64, scratch_operands = 0 : i64, tpu.core_type = #tpu.core_type<tc>, window_params = [{transform_indices = @transform_0, window_bounds = array<i64: 1, 72, 25>}, {pipeline_mode = #tpu.pipeline_mode<synchronous>, transform_indices = @transform_1, window_bounds = array<i64: 16, 72>}, {pipeline_mode = #tpu.pipeline_mode<synchronous>, transform_indices = @transform_2, window_bounds = array<i64: 16, 1>}, {transform_indices = @transform_3, window_bounds = array<i64: 1, 16, 25>}]} {
    %c0 = arith.constant 0 : index
    %c0_0 = arith.constant 0 : index
    %0 = vector.load %arg2[%c0, %c0_0] : memref<16x72xf32, #tpu.memory_space<vmem>>, vector<16x72xf32>
    %c0_1 = arith.constant 0 : index
    %c0_2 = arith.constant 0 : index
    %c0_3 = arith.constant 0 : index
    %1 = vector.load %arg1[%c0_1, %c0_2, %c0_3] : memref<1x72x25xf32, #tpu.memory_space<vmem>>, vector<1x72x25xf32>
    %2 = vector.shape_cast %1 : vector<1x72x25xf32> to vector<72x25xf32>
    %cst = arith.constant dense<0.000000e+00> : vector<16x25xf32>
    %3 = tpu.matmul %0, %2, %cst {dimension_numbers = #tpu.dot_dimension_numbers<[1], [0], [0], [1], [0, 0, 1, 1], [], []>} : vector<16x72xf32>, vector<72x25xf32>, vector<16x25xf32> -> vector<16x25xf32>
    %c0_4 = arith.constant 0 : index
    %c0_5 = arith.constant 0 : index
    %4 = vector.load %arg3[%c0_4, %c0_5] : memref<16x1xf32, #tpu.memory_space<vmem>>, vector<16x1xf32>
    %5 = vector.broadcast %4 : vector<16x1xf32> to vector<16x25xf32>
    %6 = arith.addf %3, %5 : vector<16x25xf32>
    %cst_6 = arith.constant 0.000000e+00 : f32
    %7 = vector.broadcast %cst_6 : f32 to vector<16x25xf32>
    %8 = arith.maximumf %6, %7 : vector<16x25xf32>
    %c0_7 = arith.constant 0 : index
    %c0_8 = arith.constant 0 : index
    %c0_9 = arith.constant 0 : index
    %9 = vector.load %arg4[%c0_7, %c0_8, %c0_9] : memref<1x16x25xf32, #tpu.memory_space<vmem>>, vector<1x16x25xf32>
    %10 = vector.shape_cast %9 : vector<1x16x25xf32> to vector<16x25xf32>
    %11 = vector.shape_cast %8 : vector<16x25xf32> to vector<1x16x25xf32>
    tpu.vector_store %arg4[%c0_7, %c0_8, %c0_9], %11 {strides = array<i32>} : memref<1x16x25xf32, #tpu.memory_space<vmem>>, vector<1x16x25xf32>,
    return
  }
  func.func @transform_0(%arg0: i32) -> (i32, i32, i32) {
    %c0_i32 = arith.constant 0 : i32
    %c0_i32_0 = arith.constant 0 : i32
    %c0_i32_1 = arith.constant 0 : i32
    return %arg0, %c0_i32, %c0_i32_0 : i32, i32, i32
  }
  func.func @transform_1(%arg0: i32) -> (i32, i32) {
    %c0_i32 = arith.constant 0 : i32
    %c0_i32_0 = arith.constant 0 : i32
    %c0_i32_1 = arith.constant 0 : i32
    return %c0_i32, %c0_i32_0 : i32, i32
  }
  func.func @transform_2(%arg0: i32) -> (i32, i32) {
    %c0_i32 = arith.constant 0 : i32
    %c0_i32_0 = arith.constant 0 : i32
    %c0_i32_1 = arith.constant 0 : i32
    return %c0_i32, %c0_i32_0 : i32, i32
  }
  func.func @transform_3(%arg0: i32) -> (i32, i32, i32) {
    %c0_i32 = arith.constant 0 : i32
    %c0_i32_0 = arith.constant 0 : i32
    %c0_i32_1 = arith.constant 0 : i32
    return %arg0, %c0_i32, %c0_i32_0 : i32, i32, i32
  }
}

module attributes {stable_mosaic.version = 11 : i64} {
  func.func @_matmul_bias_act_kernel(%arg0: i32, %arg1: memref<1x400x225xf32, #tpu.memory_space<vmem>>, %arg2: memref<8x400xf32, #tpu.memory_space<vmem>>, %arg3: memref<8x1xf32, #tpu.memory_space<vmem>>, %arg4: memref<1x8x225xf32, #tpu.memory_space<vmem>>) attributes {dimension_semantics = [#tpu.dimension_semantics<parallel>], iteration_bounds = array<i64: 2>, scalar_prefetch = 0 : i64, scratch_operands = 0 : i64, tpu.core_type = #tpu.core_type<tc>, window_params = [{transform_indices = @transform_0, window_bounds = array<i64: 1, 400, 225>}, {pipeline_mode = #tpu.pipeline_mode<synchronous>, transform_indices = @transform_1, window_bounds = array<i64: 8, 400>}, {pipeline_mode = #tpu.pipeline_mode<synchronous>, transform_indices = @transform_2, window_bounds = array<i64: 8, 1>}, {transform_indices = @transform_3, window_bounds = array<i64: 1, 8, 225>}]} {
    %c0 = arith.constant 0 : index
    %c0_0 = arith.constant 0 : index
    %0 = vector.load %arg2[%c0, %c0_0] : memref<8x400xf32, #tpu.memory_space<vmem>>, vector<8x400xf32>
    %c0_1 = arith.constant 0 : index
    %c0_2 = arith.constant 0 : index
    %c0_3 = arith.constant 0 : index
    %1 = vector.load %arg1[%c0_1, %c0_2, %c0_3] : memref<1x400x225xf32, #tpu.memory_space<vmem>>, vector<1x400x225xf32>
    %2 = vector.shape_cast %1 : vector<1x400x225xf32> to vector<400x225xf32>
    %cst = arith.constant dense<0.000000e+00> : vector<8x225xf32>
    %3 = tpu.matmul %0, %2, %cst {dimension_numbers = #tpu.dot_dimension_numbers<[1], [0], [0], [1], [0, 0, 1, 1], [], []>} : vector<8x400xf32>, vector<400x225xf32>, vector<8x225xf32> -> vector<8x225xf32>
    %c0_4 = arith.constant 0 : index
    %c0_5 = arith.constant 0 : index
    %4 = vector.load %arg3[%c0_4, %c0_5] : memref<8x1xf32, #tpu.memory_space<vmem>>, vector<8x1xf32>
    %5 = vector.broadcast %4 : vector<8x1xf32> to vector<8x225xf32>
    %6 = arith.addf %3, %5 : vector<8x225xf32>
    %cst_6 = arith.constant 0.000000e+00 : f32
    %7 = vector.broadcast %cst_6 : f32 to vector<8x225xf32>
    %8 = arith.maximumf %6, %7 : vector<8x225xf32>
    %c0_7 = arith.constant 0 : index
    %c0_8 = arith.constant 0 : index
    %c0_9 = arith.constant 0 : index
    %9 = vector.load %arg4[%c0_7, %c0_8, %c0_9] : memref<1x8x225xf32, #tpu.memory_space<vmem>>, vector<1x8x225xf32>
    %10 = vector.shape_cast %9 : vector<1x8x225xf32> to vector<8x225xf32>
    %11 = vector.shape_cast %8 : vector<8x225xf32> to vector<1x8x225xf32>
    tpu.vector_store %arg4[%c0_7, %c0_8, %c0_9], %11 {strides = array<i32>} : memref<1x8x225xf32, #tpu.memory_space<vmem>>, vector<1x8x225xf32>,
    return
  }
  func.func @transform_0(%arg0: i32) -> (i32, i32, i32) {
    %c0_i32 = arith.constant 0 : i32
    %c0_i32_0 = arith.constant 0 : i32
    %c0_i32_1 = arith.constant 0 : i32
    return %arg0, %c0_i32, %c0_i32_0 : i32, i32, i32
  }
  func.func @transform_1(%arg0: i32) -> (i32, i32) {
    %c0_i32 = arith.constant 0 : i32
    %c0_i32_0 = arith.constant 0 : i32
    %c0_i32_1 = arith.constant 0 : i32
    return %c0_i32, %c0_i32_0 : i32, i32
  }
  func.func @transform_2(%arg0: i32) -> (i32, i32) {
    %c0_i32 = arith.constant 0 : i32
    %c0_i32_0 = arith.constant 0 : i32
    %c0_i32_1 = arith.constant 0 : i32
    return %c0_i32, %c0_i32_0 : i32, i32
  }
  func.func @transform_3(%arg0: i32) -> (i32, i32, i32) {
    %c0_i32 = arith.constant 0 : i32
    %c0_i32_0 = arith.constant 0 : i32
    %c0_i32_1 = arith.constant 0 : i32
    return %arg0, %c0_i32, %c0_i32_0 : i32, i32, i32
  }
}

module attributes {stable_mosaic.version = 11 : i64} {
  func.func @_matmul_bias_act_kernel(%arg0: i32, %arg1: memref<1x32x784xf32, #tpu.memory_space<vmem>>, %arg2: memref<1x32xf32, #tpu.memory_space<vmem>>, %arg3: memref<1x1xf32, #tpu.memory_space<vmem>>, %arg4: memref<1x1x784xf32, #tpu.memory_space<vmem>>) attributes {dimension_semantics = [#tpu.dimension_semantics<parallel>], iteration_bounds = array<i64: 2>, scalar_prefetch = 0 : i64, scratch_operands = 0 : i64, tpu.core_type = #tpu.core_type<tc>, window_params = [{transform_indices = @transform_0, window_bounds = array<i64: 1, 32, 784>}, {pipeline_mode = #tpu.pipeline_mode<synchronous>, transform_indices = @transform_1, window_bounds = array<i64: 1, 32>}, {pipeline_mode = #tpu.pipeline_mode<synchronous>, transform_indices = @transform_2, window_bounds = array<i64: 1, 1>}, {transform_indices = @transform_3, window_bounds = array<i64: 1, 1, 784>}]} {
    %c0 = arith.constant 0 : index
    %c0_0 = arith.constant 0 : index
    %0 = vector.load %arg2[%c0, %c0_0] : memref<1x32xf32, #tpu.memory_space<vmem>>, vector<1x32xf32>
    %c0_1 = arith.constant 0 : index
    %c0_2 = arith.constant 0 : index
    %c0_3 = arith.constant 0 : index
    %1 = vector.load %arg1[%c0_1, %c0_2, %c0_3] : memref<1x32x784xf32, #tpu.memory_space<vmem>>, vector<1x32x784xf32>
    %2 = vector.shape_cast %1 : vector<1x32x784xf32> to vector<32x784xf32>
    %cst = arith.constant dense<0.000000e+00> : vector<1x784xf32>
    %3 = tpu.matmul %0, %2, %cst {dimension_numbers = #tpu.dot_dimension_numbers<[1], [0], [0], [1], [0, 0, 1, 1], [], []>} : vector<1x32xf32>, vector<32x784xf32>, vector<1x784xf32> -> vector<1x784xf32>
    %c0_4 = arith.constant 0 : index
    %c0_5 = arith.constant 0 : index
    %4 = vector.load %arg3[%c0_4, %c0_5] : memref<1x1xf32, #tpu.memory_space<vmem>>, vector<1x1xf32>
    %5 = vector.broadcast %4 : vector<1x1xf32> to vector<1x784xf32>
    %6 = arith.addf %3, %5 : vector<1x784xf32>
    %7 = math.tanh %6 : vector<1x784xf32>
    %c0_6 = arith.constant 0 : index
    %c0_7 = arith.constant 0 : index
    %c0_8 = arith.constant 0 : index
    %8 = vector.load %arg4[%c0_6, %c0_7, %c0_8] : memref<1x1x784xf32, #tpu.memory_space<vmem>>, vector<1x1x784xf32>
    %9 = vector.shape_cast %8 : vector<1x1x784xf32> to vector<1x784xf32>
    %10 = vector.shape_cast %7 : vector<1x784xf32> to vector<1x1x784xf32>
    tpu.vector_store %arg4[%c0_6, %c0_7, %c0_8], %10 {strides = array<i32>} : memref<1x1x784xf32, #tpu.memory_space<vmem>>, vector<1x1x784xf32>,
    return
  }
  func.func @transform_0(%arg0: i32) -> (i32, i32, i32) {
    %c0_i32 = arith.constant 0 : i32
    %c0_i32_0 = arith.constant 0 : i32
    %c0_i32_1 = arith.constant 0 : i32
    return %arg0, %c0_i32, %c0_i32_0 : i32, i32, i32
  }
  func.func @transform_1(%arg0: i32) -> (i32, i32) {
    %c0_i32 = arith.constant 0 : i32
    %c0_i32_0 = arith.constant 0 : i32
    %c0_i32_1 = arith.constant 0 : i32
    return %c0_i32, %c0_i32_0 : i32, i32
  }
  func.func @transform_2(%arg0: i32) -> (i32, i32) {
    %c0_i32 = arith.constant 0 : i32
    %c0_i32_0 = arith.constant 0 : i32
    %c0_i32_1 = arith.constant 0 : i32
    return %c0_i32, %c0_i32_0 : i32, i32
  }
  func.func @transform_3(%arg0: i32) -> (i32, i32, i32) {
    %c0_i32 = arith.constant 0 : i32
    %c0_i32_0 = arith.constant 0 : i32
    %c0_i32_1 = arith.constant 0 : i32
    return %arg0, %c0_i32, %c0_i32_0 : i32, i32, i32
  }
}

</mosaic_0001>

<bundles_post_ra>
// kernel: convae_forward.8
= control target key start
LH: loop header
LB: loop body
LE: loop exit
PB: predicated region body
PF: predicated region fallthrough
CT: control target
= control target key end

     0   :  { %s237_s6 = smov 0   ;;  %s254_s0 = inlined_call_operand.vmem [shape: f32[2,4,16,25], index: 0, kind: input, shape index: {}]   ;;  %s255_s1 = inlined_call_operand.vmem [shape: f32[2,16,25], index: 1, kind: output, shape index: {}]  }
   0x1 LB: > { %s192_s7 = sadd.s32 4294967295, %s225_s6   ;;  %p196_p0 = scmp.ge.s32.totalorder %s225_s6, 1  ;;  %s225_s6 = sphi %s237_s6, %s11_s6  }
   0x2   : > { %p87_p1 = scmp.lt.s32.totalorder %s225_s6, 3 }
   0x4   : > { %p88_p2 = pnand %p196_p0, %p87_p1 }
   0x5   : > { %p107_p3 = scmp.lt.s32.totalorder (!%p88_p2), %s192_s7, 1  ;;  %vm134_vm0 = vcmask (!%p88_p2), 203776  }
   0x6   : > { %91 = sbr.rel (%p88_p2) target bundleno = 25 (0x19), region = 24 }
   0xd   : > { %s257_s7 = smov (!%p107_p3, %s192_s7), 1 }
   0xe   : > { %s209_s8 = sshll.u32 %s257_s7, 6  ;;  %s210_s12 = sshll.u32 %s257_s7, 4 }
   0xf   : > { %s111_s11 = scalar_lea.vmem %s254_s0, %s209_s8  ;;  %s116_s15 = scalar_lea.vmem %s255_s1, %s210_s12 }
  0x10   : > { %v117_v0 = vld [vmem:[%s111_s11] sm:$0xff]  ;;  %v201_v1 = vld [vmem:[%s111_s11 + $0x10] sm:$0xff]  ;;  %v118_v4 = vld [vmem:[%s111_s11 + $0x8] sm:$0xff] }
  0x11   : > { %v203_v2 = vld [vmem:[%s111_s11 + $0x20] sm:$0xff]  ;;  %v122_v3 = vmax.f32 %v117_v0, %v201_v1  ;;  %v202_v5 = vld [vmem:[%s111_s11 + $0x18] sm:$0xff]  ;;  %v205_v6 = vld [vmem:[%s111_s11 + $0x30] sm:$0xff] }
  0x12   : > { %v123_v7 = vmax.f32 %v118_v4, %v202_v5  ;;  %v204_v8 = vld [vmem:[%s111_s11 + $0x28] sm:$0xff]  ;;  %v206_v10 = vld [vmem:[%s111_s11 + $0x38] sm:$0xff] }
  0x13   : > { %v127_v9 = vmax.f32 %v122_v3, %v203_v2 }
  0x14   : > { %v128_v11 = vmax.f32 %v123_v7, %v204_v8 }
  0x15   : > { %v132_v12 = vmax.f32 %v127_v9, %v205_v6 }
  0x16   : > { %v133_v13 = vmax.f32 %v128_v11, %v206_v10 }
  0x17   : > { %135 = vst.msk [vmem:[%s116_s15] sm:$0xff] %vm134_vm0, %v132_v12 }
  0x18   : > { %136 = vst.msk [vmem:[%s116_s15 + $0x8] sm:$0xff] %vm134_vm0, %v133_v13 }
  0x19 PF: > { %s11_s6 = sadd.s32 1, %s225_s6  }
  0x1a   : > { %p8_p4 = scmp.ge.s32.totalorder %s11_s6, 4  }
  0x1c   :  { %10 = sbr.rel (!%p8_p4) target bundleno = 1 (0x1), region = 57 }

// kernel: convae_forward.7
= control target key start
LH: loop header
LB: loop body
LE: loop exit
PB: predicated region body
PF: predicated region fallthrough
CT: control target
= control target key end

     0   :  { %s407_s12 = smov 0   ;;  %s438_s0 = inlined_call_operand.vmem [shape: f32[2,9,100], index: 0, kind: input, shape index: {}]   ;;  %s439_s1 = inlined_call_operand.vmem [shape: f32[16,9], index: 1, kind: input, shape index: {}]   ;;  %s440_s2 = inlined_call_operand.vmem [shape: f32[16,1], index: 2, kind: input, shape index: {}]   ;;  %s441_s3 = inlined_call_operand.vmem [shape: f32[2,16,100], index: 3, kind: output, shape index: {}]  }
   0x1 LB: > { %s333_s13 = sadd.s32 4294967295, %s383_s12   ;;  %p337_p0 = scmp.ge.s32.totalorder %s383_s12, 1  ;;  %s383_s12 = sphi %s407_s12, %s13_s12  }
   0x2   : > { %p137_p1 = scmp.lt.s32.totalorder %s383_s12, 3 }
   0x4   : > { %p138_p2 = pnand %p337_p0, %p137_p1 }
   0x5   : > { %p161_p3 = scmp.lt.s32.totalorder (!%p138_p2), %s333_s13, 1  ;;  %v171_v0 = vld [vmem:[%s439_s1] sm:$0xff] (!%p138_p2)  ;;  %vm187_vm0 = vcmask (!%p138_p2), 72704   ;;  %v385_v2 = vmov (!%p138_p2), 0   ;;  %vm194_vm1 = vcmask (!%p138_p2), 1040384   ;;  %v176_v3 = vld [vmem:[%s440_s2 + $0x8] sm:$0xff] (!%p138_p2) }
   0x6   : > { %141 = sbr.rel (%p138_p2) target bundleno = 241 (0xf1), region = 32  ;;  %357 = vmatprep.mubr.msk.f32.mxu0 (!%p138_p2), %vm187_vm0, %v171_v0  ;;  %v175_v1 = vld [vmem:[%s440_s2] sm:$0xff] (!%p138_p2)  ;;  %376 = vset.pattern.permute.xlu0 (!%p138_p2), %v385_v2  ;;  %vm386_vm2 = vmmov (!%p138_p2), 1   ;;  %v172_v7 = vld [vmem:[%s439_s1 + $0x8] sm:$0xff] (!%p138_p2)  ;;  %vm275_vm4 = vcmask (!%p138_p2), 818176  }
   0x7   : > { %179 = vperm.xlu0 (!%p138_p2), %376, %v175_v1   ;;  %vm361_vm3 = vmpackc.low (!%p138_p2), %vm194_vm1, %vm386_vm2 }
   0xb   : > { %184 = vperm.xlu0 (!%p138_p2), %376, %v176_v3  }
   0xd   : > { %s443_s13 = smov (!%p161_p3, %s333_s13), 1 }
   0xe   : > { %s347_s18 = sshll.u32 %s443_s13, 4 }
   0xf   : > { %s165_s23 = scalar_lea.vmem %s438_s0, %s347_s18  ;;  %s170_s28 = scalar_lea.vmem %s441_s3, %s347_s18 }
  0x10   : > { %v173_v4 = vld [vmem:[%s165_s23] sm:$0xff]  ;;  %v174_v5 = vld [vmem:[%s165_s23 + $0x8] sm:$0x1] }
  0x11   : > { %v360_v6 = vpack.c.bf16 %v174_v5, %v173_v4 }
  0x13   : > { %362 = vmatprep.subr.msk.bf16.mxu0 %vm361_vm3, %v360_v6 }
  0x14   : > { %365 = vmatpush3.bf16.msk.msra.mxu0 %vm361_vm3, %v360_v6 }
  0x17   : > { %358 = vmatmul.mubr.msk.f32.vlgmr.msra.gmra.mrb[0].mxu0 %vm187_vm0, %v172_v7 }
  0x86   : > { %v180_v8 = vpop.permute.xlu0 %179 }
  0x8a   : > { %v185_v9 = vpop.permute.xlu0 %184 }
  0xea   : > { %v359_v10 = vpop.f32.mrb[0].mxu0 }
  0xeb   : > { %v270_v11 = vadd.f32 %v359_v10, %v185_v9  ;;  %v264_v12 = vpop.f32.mrb[1].mxu0 }
  0xec   : > { %v265_v13 = vadd.f32 %v264_v12, %v180_v8 }
  0xed   : > { %v274_v14 = vmax.f32 %v270_v11, 0.0 }
  0xee   : > { %v273_v15 = vmax.f32 %v265_v13, 0.0 }
  0xef   : > { %277 = vst.msk [vmem:[%s170_s28 + $0x8] sm:$0xff] %vm275_vm4, %v274_v14 }
  0xf0   : > { %276 = vst.msk [vmem:[%s170_s28] sm:$0xff] %vm275_vm4, %v273_v15 }
  0xf1 PF: > { %s13_s12 = sadd.s32 1, %s383_s12  }
  0xf2   : > { %p10_p4 = scmp.ge.s32.totalorder %s13_s12, 4  }
  0xf4   :  { %12 = sbr.rel (!%p10_p4) target bundleno = 1 (0x1), region = 62 }

// kernel: convae_forward.10
= control target key start
LH: loop header
LB: loop body
LE: loop exit
PB: predicated region body
PF: predicated region fallthrough
CT: control target
= control target key end

     0   :  { %s206_s6 = smov 0   ;;  %s226_s0 = inlined_call_operand.vmem [shape: f32[2,4,8,4], index: 0, kind: input, shape index: {}]   ;;  %s227_s1 = inlined_call_operand.vmem [shape: f32[2,8,4], index: 1, kind: output, shape index: {}]  }
   0x1 LB: > { %s180_s7 = sadd.s32 4294967295, %s208_s6   ;;  %p184_p0 = scmp.ge.s32.totalorder %s208_s6, 1  ;;  %s208_s6 = sphi %s206_s6, %s11_s6  }
   0x2   : > { %p87_p1 = scmp.lt.s32.totalorder %s208_s6, 3 }
   0x4   : > { %p88_p2 = pnand %p184_p0, %p87_p1 }
   0x5   : > { %p106_p3 = scmp.lt.s32.totalorder (!%p88_p2), %s180_s7, 1  ;;  %vm125_vm0 = vcmask (!%p88_p2), 31744  }
   0x6   : > { %91 = sbr.rel (%p88_p2) target bundleno = 24 (0x18), region = 24 }
   0xd   : > { %s229_s7 = smov (!%p106_p3, %s180_s7), 1 }
   0xe   : > { %s193_s8 = sshll.u32 %s229_s7, 5  ;;  %s187_s12 = sshll.u32 %s229_s7, 3 }
   0xf   : > { %s110_s11 = scalar_lea.vmem %s226_s0, %s193_s8  ;;  %s114_s15 = scalar_lea.vmem %s227_s1, %s187_s12 }
  0x10   : > { %v115_v0 = vld [vmem:[%s110_s11] sm:$0xff]  ;;  %v188_v1 = vld [vmem:[%s110_s11 + $0x8] sm:$0xff]  ;;  %v189_v2 = vld [vmem:[%s110_s11 + $0x10] sm:$0xff] }
  0x11   : > { %v118_v3 = vmax.f32 %v115_v0, %v188_v1  ;;  %v190_v4 = vld [vmem:[%s110_s11 + $0x18] sm:$0xff] }
  0x13   : > { %v121_v5 = vmax.f32 %v118_v3, %v189_v2 }
  0x15   : > { %v124_v6 = vmax.f32 %v121_v5, %v190_v4 }
  0x17   : > { %126 = vst.msk [vmem:[%s114_s15] sm:$0xff] %vm125_vm0, %v124_v6 }
  0x18 PF: > { %s11_s6 = sadd.s32 1, %s208_s6  }
  0x19   : > { %p8_p4 = scmp.ge.s32.totalorder %s11_s6, 4  }
  0x1b   :  { %10 = sbr.rel (!%p8_p4) target bundleno = 1 (0x1), region = 57 }

// kernel: convae_forward.9
= control target key start
LH: loop header
LB: loop body
LE: loop exit
PB: predicated region body
PF: predicated region fallthrough
CT: control target
= control target key end

     0   :  { %s404_s12 = smov 0   ;;  %s454_s0 = inlined_call_operand.vmem [shape: f32[2,144,9], index: 0, kind: input, shape index: {}]   ;;  %s455_s1 = inlined_call_operand.vmem [shape: f32[8,144], index: 1, kind: input, shape index: {}]   ;;  %s456_s2 = inlined_call_operand.vmem [shape: f32[8,1], index: 2, kind: input, shape index: {}]   ;;  %s457_s3 = inlined_call_operand.vmem [shape: f32[2,8,9], index: 3, kind: output, shape index: {}]  }
   0x1 LB: > { %s325_s13 = sadd.s32 4294967295, %s380_s12   ;;  %p329_p0 = scmp.ge.s32.totalorder %s380_s12, 1  ;;  %s380_s12 = sphi %s404_s12, %s13_s12  }
   0x2   : > { %p137_p1 = scmp.lt.s32.totalorder %s380_s12, 3 }
   0x4   : > { %p138_p2 = pnand %p329_p0, %p137_p1 }
   0x5   : > { %p160_p3 = scmp.lt.s32.totalorder (!%p138_p2), %s325_s13, 1  ;;  %v170_v0 = vld [vmem:[%s455_s1 + $0x8] sm:$0xff] (!%p138_p2)  ;;  %vm195_vm0 = vcmask (!%p138_p2), 130048   ;;  %v382_v1 = vmov (!%p138_p2), 0.0|0.0   ;;  %v189_v2 = vld [vmem:[%s456_s2] sm:$0xff] (!%p138_p2)  ;;  %v383_v3 = vmov (!%p138_p2), 0  }
   0x6   : > { %141 = sbr.rel (%p138_p2) target bundleno = 272 (0x110), region = 32  ;;  %335 = vmatprep.subr.bf16.mxu0 (!%p138_p2), %v382_v1  ;;  %332 = vmatprep.mubr.msk.f32.mxu0 (!%p138_p2), %vm195_vm0, %v170_v0  ;;  %v169_v31 = vld [vmem:[%s455_s1] sm:$0xff] (!%p138_p2)  ;;  %vm270_vm1 = vcmask (!%p138_p2), 72704  }
   0x7   : > { %373 = vset.pattern.permute.xlu0 (!%p138_p2), %v383_v3 }
   0x8   : > { %192 = vperm.xlu0 (!%p138_p2), %373, %v189_v2  }
   0xd   : > { %s459_s13 = smov (!%p160_p3, %s325_s13), 1 }
   0xe   : > { %s362_s18 = smul.u32 144, %s459_s13  ;;  %s331_s24 = sshll.u32 %s459_s13, 3 }
   0xf   : > { %s168_s27 = scalar_lea.vmem %s457_s3, %s331_s24 }
  0x10   : > { %s424_s21 = scalar_lea.vmem %s454_s0, %s362_s18 }
  0x11   : > { %v171_v4 = vld [vmem:[%s424_s21] sm:$0xff]  ;;  %v172_v5 = vld [vmem:[%s424_s21 + $0x8] sm:$0xff]  ;;  %v173_v6 = vld [vmem:[%s424_s21 + $0x10] sm:$0xff] }
  0x12   : > { %v336_v7 = vpack.c.bf16 %v172_v5, %v171_v4  ;;  %v174_v8 = vld [vmem:[%s424_s21 + $0x18] sm:$0xff]  ;;  %v175_v10 = vld [vmem:[%s424_s21 + $0x20] sm:$0xff]  ;;  %v176_v11 = vld [vmem:[%s424_s21 + $0x28] sm:$0xff] }
  0x13   : > { %v339_v9 = vpack.c.bf16 %v174_v8, %v173_v6  ;;  %v342_v12 = vpack.c.bf16 %v176_v11, %v175_v10  ;;  %v177_v13 = vld [vmem:[%s424_s21 + $0x30] sm:$0xff]  ;;  %v178_v14 = vld [vmem:[%s424_s21 + $0x38] sm:$0xff]  ;;  %v179_v16 = vld [vmem:[%s424_s21 + $0x40] sm:$0xff] }
  0x14   : > { %337 = vmatpush1.bf16.msra.mxu0 %v336_v7  ;;  %v345_v15 = vpack.c.bf16 %v178_v14, %v177_v13  ;;  %v180_v17 = vld [vmem:[%s424_s21 + $0x48] sm:$0xff]  ;;  %v181_v19 = vld [vmem:[%s424_s21 + $0x50] sm:$0xff]  ;;  %v182_v20 = vld [vmem:[%s424_s21 + $0x58] sm:$0xff] }
  0x15   : > { %338 = vmatprep.subr.bf16.mxu0 %v382_v1  ;;  %v348_v18 = vpack.c.bf16 %v180_v17, %v179_v16  ;;  %v351_v21 = vpack.c.bf16 %v182_v20, %v181_v19  ;;  %v183_v22 = vld [vmem:[%s424_s21 + $0x60] sm:$0xff]  ;;  %v184_v23 = vld [vmem:[%s424_s21 + $0x68] sm:$0xff]  ;;  %v185_v25 = vld [vmem:[%s424_s21 + $0x70] sm:$0xff] }
  0x16   : > { %v354_v24 = vpack.c.bf16 %v184_v23, %v183_v22  ;;  %v186_v26 = vld [vmem:[%s424_s21 + $0x78] sm:$0xff]  ;;  %v187_v28 = vld [vmem:[%s424_s21 + $0x80] sm:$0xff]  ;;  %v188_v29 = vld [vmem:[%s424_s21 + $0x88] sm:$0xff] }
  0x17   : > { %v357_v27 = vpack.c.bf16 %v186_v26, %v185_v25  ;;  %v360_v30 = vpack.c.bf16 %v188_v29, %v187_v28 }
  0x18   : > { %340 = vmatpush1.bf16.msra.mxu0 %v339_v9 }
  0x19   : > { %341 = vmatprep.subr.bf16.mxu0 %v382_v1 }
  0x1c   : > { %343 = vmatpush1.bf16.msra.mxu0 %v342_v12 }
  0x1d   : > { %344 = vmatprep.subr.bf16.mxu0 %v382_v1 }
  0x20   : > { %346 = vmatpush1.bf16.msra.mxu0 %v345_v15 }
  0x21   : > { %347 = vmatprep.subr.bf16.mxu0 %v382_v1 }
  0x24   : > { %349 = vmatpush1.bf16.msra.mxu0 %v348_v18 }
  0x25   : > { %350 = vmatprep.subr.bf16.mxu0 %v382_v1 }
  0x28   : > { %352 = vmatpush1.bf16.msra.mxu0 %v351_v21 }
  0x29   : > { %353 = vmatprep.subr.bf16.mxu0 %v382_v1 }
  0x2c   : > { %355 = vmatpush1.bf16.msra.mxu0 %v354_v24 }
  0x2d   : > { %356 = vmatprep.subr.bf16.mxu0 %v382_v1 }
  0x30   : > { %358 = vmatpush1.bf16.msra.mxu0 %v357_v27 }
  0x31   : > { %359 = vmatprep.subr.bf16.mxu0 %v382_v1 }
  0x34   : > { %361 = vmatpush1.bf16.msra.mxu0 %v360_v30 }
  0x37   : > { %264 = vmatmul.mubr.f32.vlgmr.msra.gmra.mrb[0].mxu0 %v169_v31 }
  0x87   : > { %v193_v32 = vpop.permute.xlu0 %192 }
 0x10a   : > { %v265_v33 = vpop.f32.mrb[0].mxu0 }
 0x10b   : > { %v266_v34 = vadd.f32 %v265_v33, %v193_v32  ;;  %v267_v35 = vpop.f32.mrb[1].mxu0 }
 0x10d   : > { %v269_v36 = vmax.f32 %v266_v34, 0.0 }
 0x10f   : > { %271 = vst.msk [vmem:[%s168_s27] sm:$0xff] %vm270_vm1, %v269_v36 }
 0x110 PF: > { %s13_s12 = sadd.s32 1, %s380_s12  }
 0x111   : > { %p10_p4 = scmp.ge.s32.totalorder %s13_s12, 4  }
 0x113   :  { %12 = sbr.rel (!%p10_p4) target bundleno = 1 (0x1), region = 62 }

// kernel: convae_forward.11
= control target key start
LH: loop header
LB: loop body
LE: loop exit
PB: predicated region body
PF: predicated region fallthrough
CT: control target
= control target key end

     0   :  { %s437_s12 = smov 0   ;;  %s472_s0 = inlined_call_operand.vmem [shape: f32[2,72,25], index: 0, kind: input, shape index: {}]   ;;  %s473_s1 = inlined_call_operand.vmem [shape: f32[16,72], index: 1, kind: input, shape index: {}]   ;;  %s474_s2 = inlined_call_operand.vmem [shape: f32[16,1], index: 2, kind: input, shape index: {}]   ;;  %s475_s3 = inlined_call_operand.vmem [shape: f32[2,16,25], index: 3, kind: output, shape index: {}]  }
   0x1 LB: > { %s336_s13 = sadd.s32 4294967295, %s414_s12   ;;  %p340_p0 = scmp.ge.s32.totalorder %s414_s12, 1  ;;  %s414_s12 = sphi %s437_s12, %s13_s12  }
   0x2   : > { %p137_p1 = scmp.lt.s32.totalorder %s414_s12, 3 }
   0x4   : > { %p138_p2 = pnand %p340_p0, %p137_p1 }
   0x5   : > { %p161_p3 = scmp.lt.s32.totalorder (!%p138_p2), %s336_s13, 1  ;;  %v171_v0 = vld [vmem:[%s473_s1] sm:$0xff] (!%p138_p2)  ;;  %vm194_vm0 = vcmask (!%p138_p2), 588800   ;;  %v416_v2 = vmov (!%p138_p2), 0   ;;  %v183_v3 = vld [vmem:[%s474_s2 + $0x8] sm:$0xff] (!%p138_p2)  ;;  %vm278_vm1 = vcmask (!%p138_p2), 203776  }
   0x6   : > { %141 = sbr.rel (%p138_p2) target bundleno = 256 (0x100), region = 32  ;;  %v182_v1 = vld [vmem:[%s474_s2] sm:$0xff] (!%p138_p2)  ;;  %378 = vmatprep.mubr.msk.f32.mxu0 (!%p138_p2), %vm194_vm0, %v171_v0  ;;  %407 = vset.pattern.permute.xlu0 (!%p138_p2), %v416_v2  ;;  %v172_v17 = vld [vmem:[%s473_s1 + $0x8] sm:$0xff] (!%p138_p2) }
   0x7   : > { %186 = vperm.xlu0 (!%p138_p2), %407, %v182_v1  }
   0xb   : > { %191 = vperm.xlu0 (!%p138_p2), %407, %v183_v3  }
   0xd   : > { %s477_s13 = smov (!%p161_p3, %s336_s13), 1 }
   0xe   : > { %s397_s20 = smul.u32 72, %s477_s13  ;;  %s348_s26 = sshll.u32 %s477_s13, 4 }
   0xf   : > { %s170_s29 = scalar_lea.vmem %s475_s3, %s348_s26 }
  0x10   : > { %s165_s23 = scalar_lea.vmem %s472_s0, %s397_s20 }
  0x11   : > { %v173_v4 = vld [vmem:[%s165_s23] sm:$0xff]  ;;  %v174_v5 = vld [vmem:[%s165_s23 + $0x8] sm:$0xff]  ;;  %v175_v6 = vld [vmem:[%s165_s23 + $0x10] sm:$0xff] }
  0x12   : > { %v381_v7 = vpack.c.bf16 %v174_v5, %v173_v4  ;;  %v176_v8 = vld [vmem:[%s165_s23 + $0x18] sm:$0xff]  ;;  %v177_v10 = vld [vmem:[%s165_s23 + $0x20] sm:$0xff]  ;;  %v178_v11 = vld [vmem:[%s165_s23 + $0x28] sm:$0xff] }
  0x13   : > { %v385_v9 = vpack.c.bf16 %v176_v8, %v175_v6  ;;  %v389_v12 = vpack.c.bf16 %v178_v11, %v177_v10  ;;  %v179_v13 = vld [vmem:[%s165_s23 + $0x30] sm:$0xff]  ;;  %v180_v14 = vld [vmem:[%s165_s23 + $0x38] sm:$0xff]  ;;  %v181_v16 = vld [vmem:[%s165_s23 + $0x40] sm:$0xff] }
  0x14   : > { %382 = vmatprep.subr.bf16.mxu0 %v381_v7  ;;  %v393_v15 = vpack.c.bf16 %v180_v14, %v179_v13 }
  0x15   : > { %384 = vmatpush3.bf16.msra.mxu0 %v381_v7 }
  0x16   : > { %386 = vmatprep.subr.bf16.mxu0 %v385_v9 }
  0x19   : > { %388 = vmatpush3.bf16.msra.mxu0 %v385_v9 }
  0x1a   : > { %390 = vmatprep.subr.bf16.mxu0 %v389_v12 }
  0x1d   : > { %392 = vmatpush3.bf16.msra.mxu0 %v389_v12 }
  0x1e   : > { %394 = vmatprep.subr.bf16.mxu0 %v393_v15 }
  0x21   : > { %396 = vmatpush3.bf16.msra.mxu0 %v393_v15 }
  0x22   : > { %376 = vmatprep.subr.mxu0 %v181_v16 }
  0x25   : > { %377 = vmatpush3.msra.mxu0 %v181_v16 }
  0x26   : > { %379 = vmatmul.mubr.msk.f32.vlgmr.msra.gmra.mrb[0].mxu0 %vm194_vm0, %v172_v17 }
  0x86   : > { %v187_v18 = vpop.permute.xlu0 %186 }
  0x8a   : > { %v192_v19 = vpop.permute.xlu0 %191 }
  0xf9   : > { %v380_v20 = vpop.f32.mrb[0].mxu0 }
  0xfa   : > { %v273_v21 = vadd.f32 %v380_v20, %v192_v19  ;;  %v267_v22 = vpop.f32.mrb[1].mxu0 }
  0xfb   : > { %v268_v23 = vadd.f32 %v267_v22, %v187_v18 }
  0xfc   : > { %v277_v24 = vmax.f32 %v273_v21, 0.0 }
  0xfd   : > { %v276_v25 = vmax.f32 %v268_v23, 0.0 }
  0xfe   : > { %280 = vst.msk [vmem:[%s170_s29 + $0x8] sm:$0xff] %vm278_vm1, %v277_v24 }
  0xff   : > { %279 = vst.msk [vmem:[%s170_s29] sm:$0xff] %vm278_vm1, %v276_v25 }
 0x100 PF: > { %s13_s12 = sadd.s32 1, %s414_s12  }
 0x101   : > { %p10_p4 = scmp.ge.s32.totalorder %s13_s12, 4  }
 0x103   :  { %12 = sbr.rel (!%p10_p4) target bundleno = 1 (0x1), region = 62 }

// kernel: convae_forward.12
= control target key start
LH: loop header
LB: loop body
LE: loop exit
PB: predicated region body
PF: predicated region fallthrough
CT: control target
= control target key end

     0   :  { %s643_s12 = smov 0   ;;  %s781_s0 = inlined_call_operand.vmem [shape: f32[2,400,225], index: 0, kind: input, shape index: {}]   ;;  %s782_s1 = inlined_call_operand.vmem [shape: f32[8,400], index: 1, kind: input, shape index: {}]   ;;  %s783_s2 = inlined_call_operand.vmem [shape: f32[8,1], index: 2, kind: input, shape index: {}]   ;;  %s784_s3 = inlined_call_operand.vmem [shape: f32[2,8,225], index: 3, kind: output, shape index: {}]  }
   0x1 LB: > { %s487_s13 = sadd.s32 4294967295, %s620_s12   ;;  %p491_p0 = scmp.ge.s32.totalorder %s620_s12, 1  ;;  %s620_s12 = sphi %s643_s12, %s13_s12  }
   0x2   : > { %p137_p1 = scmp.lt.s32.totalorder %s620_s12, 3 }
   0x4   : > { %p138_p2 = pnand %p491_p0, %p137_p1 }
   0x5   : > { %p161_p3 = scmp.lt.s32.totalorder (!%p138_p2), %s487_s13, 1  ;;  %v172_v0 = vld [vmem:[%s782_s1 + $0x8] sm:$0xff] (!%p138_p2)  ;;  %v174_v1 = vld [vmem:[%s782_s1 + $0x18] sm:$0xff] (!%p138_p2)  ;;  %vm281_vm0 = vcmask (!%p138_p2), 130048   ;;  %v275_v2 = vld [vmem:[%s783_s2] sm:$0xff] (!%p138_p2)  ;;  %v622_v3 = vmov (!%p138_p2), 0  }
   0x6   : > { %141 = sbr.rel (%p138_p2) target bundleno = 304 (0x130), region = 32  ;;  %349 = vmatprep.mubr.f32.mxu1 (!%p138_p2), %v172_v0  ;;  %495 = vmatprep.mubr.msk.f32.mxu0 (!%p138_p2), %vm281_vm0, %v174_v1  ;;  %vm430_vm1 = vcmask (!%p138_p2), 793600  }
   0x7   : > { %613 = vset.pattern.permute.xlu0 (!%p138_p2), %v622_v3 }
   0x8   : > { %278 = vperm.xlu0 (!%p138_p2), %613, %v275_v2  }
   0xd   : > { %s786_s13 = smov (!%p161_p3, %s487_s13), 1 }
   0xe   : > { %s603_s20 = smul.u32 800, %s786_s13  ;;  %s498_s28 = sshll.u32 %s786_s13, 4 }
   0xf   : > { %s170_s4 = scalar_lea.vmem %s784_s3, %s498_s28 }
  0x10   : > { %s666_s23 = scalar_lea.vmem %s781_s0, %s603_s20 }
  0x11   : > { %v176_v4 = vld [vmem:[%s666_s23 + $0x8] sm:$0xff]  ;;  %v178_v5 = vld [vmem:[%s666_s23 + $0x18] sm:$0xff]  ;;  %v175_v6 = vld [vmem:[%s666_s23] sm:$0xff] }
  0x12   : > { %v499_v7 = vpack.c.bf16 %v178_v5, %v176_v4  ;;  %v177_v8 = vld [vmem:[%s666_s23 + $0x10] sm:$0xff]  ;;  %v180_v9 = vld [vmem:[%s666_s23 + $0x28] sm:$0xff]  ;;  %v182_v10 = vld [vmem:[%s666_s23 + $0x38] sm:$0xff] }
  0x13   : > { %v501_v11 = vpack.c.bf16 %v177_v8, %v175_v6  ;;  %v503_v12 = vpack.c.bf16 %v182_v10, %v180_v9  ;;  %v179_v13 = vld [vmem:[%s666_s23 + $0x20] sm:$0xff]  ;;  %v181_v14 = vld [vmem:[%s666_s23 + $0x30] sm:$0xff]  ;;  %v184_v15 = vld [vmem:[%s666_s23 + $0x48] sm:$0xff] }
  0x14   : > { %500 = vmatprep.subr.bf16.mxu1 %v499_v7  ;;  %v186_v16 = vld [vmem:[%s666_s23 + $0x58] sm:$0xff]  ;;  %v505_v17 = vpack.c.bf16 %v181_v14, %v179_v13  ;;  %v183_v19 = vld [vmem:[%s666_s23 + $0x40] sm:$0xff]  ;;  %v185_v20 = vld [vmem:[%s666_s23 + $0x50] sm:$0xff] }
  0x15   : > { %502 = vmatpush1.bf16.msra.mxu1 %v501_v11  ;;  %v507_v18 = vpack.c.bf16 %v186_v16, %v184_v15  ;;  %v188_v21 = vld [vmem:[%s666_s23 + $0x68] sm:$0xff]  ;;  %v190_v22 = vld [vmem:[%s666_s23 + $0x78] sm:$0xff]  ;;  %v509_v23 = vpack.c.bf16 %v185_v20, %v183_v19  ;;  %v187_v25 = vld [vmem:[%s666_s23 + $0x60] sm:$0xff] }
  0x16   : > { %504 = vmatprep.subr.bf16.mxu1 %v503_v12  ;;  %v511_v24 = vpack.c.bf16 %v190_v22, %v188_v21  ;;  %v189_v26 = vld [vmem:[%s666_s23 + $0x70] sm:$0xff]  ;;  %v192_v27 = vld [vmem:[%s666_s23 + $0x88] sm:$0xff]  ;;  %v194_v28 = vld [vmem:[%s666_s23 + $0x98] sm:$0xff] }
  0x17   : > { %v240_v29 = vld [vmem:[%s666_s23 + $0x208] sm:$0xff]  ;;  %v242_v30 = vld [vmem:[%s666_s23 + $0x218] sm:$0xff]  ;;  %v239_v31 = vld [vmem:[%s666_s23 + $0x200] sm:$0xff]  ;;  %v513_v33 = vpack.c.bf16 %v189_v26, %v187_v25  ;;  %v515_v38 = vpack.c.bf16 %v194_v28, %v192_v27 }
  0x18   : > { %v241_v32 = vld [vmem:[%s666_s23 + $0x210] sm:$0xff]  ;;  %v191_v34 = vld [vmem:[%s666_s23 + $0x80] sm:$0xff]  ;;  %v563_v36 = vpack.c.bf16 %v242_v30, %v240_v29  ;;  %v196_v39 = vld [vmem:[%s666_s23 + $0xa8] sm:$0xff] }
  0x19   : > { %506 = vmatpush1.bf16.msra.mxu1 %v505_v17  ;;  %v193_v35 = vld [vmem:[%s666_s23 + $0x90] sm:$0xff]  ;;  %v565_v37 = vpack.c.bf16 %v241_v32, %v239_v31  ;;  %v244_v40 = vld [vmem:[%s666_s23 + $0x228] sm:$0xff]  ;;  %v246_v41 = vld [vmem:[%s666_s23 + $0x238] sm:$0xff] }
  0x1a   : > { %508 = vmatprep.subr.bf16.mxu1 %v507_v18  ;;  %v198_v42 = vld [vmem:[%s666_s23 + $0xb8] sm:$0xff]  ;;  %564 = vmatprep.subr.bf16.mxu0 %v563_v36  ;;  %v567_v43 = vpack.c.bf16 %v246_v41, %v244_v40  ;;  %v243_v44 = vld [vmem:[%s666_s23 + $0x220] sm:$0xff]  ;;  %v245_v45 = vld [vmem:[%s666_s23 + $0x230] sm:$0xff]  ;;  %v517_v47 = vpack.c.bf16 %v193_v35, %v191_v34 }
  0x1b   : > { %566 = vmatpush1.bf16.msra.mxu0 %v565_v37  ;;  %v569_v46 = vpack.c.bf16 %v245_v45, %v243_v44  ;;  %v248_v48 = vld [vmem:[%s666_s23 + $0x248] sm:$0xff]  ;;  %v250_v49 = vld [vmem:[%s666_s23 + $0x258] sm:$0xff]  ;;  %v247_v50 = vld [vmem:[%s666_s23 + $0x240] sm:$0xff]  ;;  %v519_v51 = vpack.c.bf16 %v198_v42, %v196_v39 }
  0x1c   : > { %568 = vmatprep.subr.bf16.mxu0 %v567_v43  ;;  %v195_v52 = vld [vmem:[%s666_s23 + $0xa0] sm:$0xff]  ;;  %v197_v53 = vld [vmem:[%s666_s23 + $0xb0] sm:$0xff]  ;;  %v571_v54 = vpack.c.bf16 %v250_v49, %v248_v48  ;;  %v200_v56 = vld [vmem:[%s666_s23 + $0xc8] sm:$0xff] }
  0x1d   : > { %510 = vmatpush1.bf16.msra.mxu1 %v509_v23  ;;  %v249_v55 = vld [vmem:[%s666_s23 + $0x250] sm:$0xff]  ;;  %v202_v57 = vld [vmem:[%s666_s23 + $0xd8] sm:$0xff]  ;;  %v252_v58 = vld [vmem:[%s666_s23 + $0x268] sm:$0xff]  ;;  %v521_v61 = vpack.c.bf16 %v197_v53, %v195_v52 }
  0x1e   : > { %512 = vmatprep.subr.bf16.mxu1 %v511_v24  ;;  %v573_v59 = vpack.c.bf16 %v249_v55, %v247_v50  ;;  %v254_v60 = vld [vmem:[%s666_s23 + $0x278] sm:$0xff]  ;;  %v199_v62 = vld [vmem:[%s666_s23 + $0xc0] sm:$0xff]  ;;  %v253_v1 = vld [vmem:[%s666_s23 + $0x270] sm:$0xff]  ;;  %v523_v2 = vpack.c.bf16 %v202_v57, %v200_v56 }
  0x1f   : > { %570 = vmatpush1.bf16.msra.mxu0 %v569_v46  ;;  %v575_v63 = vpack.c.bf16 %v254_v60, %v252_v58  ;;  %v251_v0 = vld [vmem:[%s666_s23 + $0x260] sm:$0xff]  ;;  %v201_v3 = vld [vmem:[%s666_s23 + $0xd0] sm:$0xff]  ;;  %v256_v4 = vld [vmem:[%s666_s23 + $0x288] sm:$0xff] }
  0x20   : > { %572 = vmatprep.subr.bf16.mxu0 %v571_v54  ;;  %v258_v5 = vld [vmem:[%s666_s23 + $0x298] sm:$0xff]  ;;  %v204_v6 = vld [vmem:[%s666_s23 + $0xe8] sm:$0xff]  ;;  %v577_v8 = vpack.c.bf16 %v253_v1, %v251_v0  ;;  %v525_v9 = vpack.c.bf16 %v201_v3, %v199_v62  ;;  %v203_v10 = vld [vmem:[%s666_s23 + $0xe0] sm:$0xff] }
  0x21   : > { %514 = vmatpush1.bf16.msra.mxu1 %v513_v33  ;;  %v206_v7 = vld [vmem:[%s666_s23 + $0xf8] sm:$0xff]  ;;  %v579_v11 = vpack.c.bf16 %v258_v5, %v256_v4  ;;  %v255_v12 = vld [vmem:[%s666_s23 + $0x280] sm:$0xff]  ;;  %v257_v13 = vld [vmem:[%s666_s23 + $0x290] sm:$0xff] }
  0x22   : > { %516 = vmatprep.subr.bf16.mxu1 %v515_v38  ;;  %v527_v14 = vpack.c.bf16 %v206_v7, %v204_v6  ;;  %v205_v15 = vld [vmem:[%s666_s23 + $0xf0] sm:$0xff]  ;;  %v260_v16 = vld [vmem:[%s666_s23 + $0x2a8] sm:$0xff]  ;;  %v262_v17 = vld [vmem:[%s666_s23 + $0x2b8] sm:$0xff]  ;;  %v581_v20 = vpack.c.bf16 %v257_v13, %v255_v12 }
  0x23   : > { %574 = vmatpush1.bf16.msra.mxu0 %v573_v59  ;;  %v208_v18 = vld [vmem:[%s666_s23 + $0x108] sm:$0xff]  ;;  %v210_v19 = vld [vmem:[%s666_s23 + $0x118] sm:$0xff]  ;;  %v529_v21 = vpack.c.bf16 %v205_v15, %v203_v10  ;;  %v207_v22 = vld [vmem:[%s666_s23 + $0x100] sm:$0xff]  ;;  %v583_v23 = vpack.c.bf16 %v262_v17, %v260_v16 }
  0x24   : > { %576 = vmatprep.subr.bf16.mxu0 %v575_v63  ;;  %v259_v24 = vld [vmem:[%s666_s23 + $0x2a0] sm:$0xff]  ;;  %v261_v25 = vld [vmem:[%s666_s23 + $0x2b0] sm:$0xff]  ;;  %v531_v26 = vpack.c.bf16 %v210_v19, %v208_v18  ;;  %v264_v28 = vld [vmem:[%s666_s23 + $0x2c8] sm:$0xff] }
  0x25   : > { %518 = vmatpush1.bf16.msra.mxu1 %v517_v47  ;;  %v209_v27 = vld [vmem:[%s666_s23 + $0x110] sm:$0xff]  ;;  %v266_v29 = vld [vmem:[%s666_s23 + $0x2d8] sm:$0xff]  ;;  %v212_v30 = vld [vmem:[%s666_s23 + $0x128] sm:$0xff]  ;;  %v585_v32 = vpack.c.bf16 %v261_v25, %v259_v24 }
  0x26   : > { %520 = vmatprep.subr.bf16.mxu1 %v519_v51  ;;  %v214_v31 = vld [vmem:[%s666_s23 + $0x138] sm:$0xff]  ;;  %v533_v33 = vpack.c.bf16 %v209_v27, %v207_v22  ;;  %v211_v34 = vld [vmem:[%s666_s23 + $0x120] sm:$0xff]  ;;  %v587_v35 = vpack.c.bf16 %v266_v29, %v264_v28  ;;  %v265_v37 = vld [vmem:[%s666_s23 + $0x2d0] sm:$0xff] }
  0x27   : > { %578 = vmatpush1.bf16.msra.mxu0 %v577_v8  ;;  %v263_v36 = vld [vmem:[%s666_s23 + $0x2c0] sm:$0xff]  ;;  %v535_v38 = vpack.c.bf16 %v214_v31, %v212_v30  ;;  %v213_v39 = vld [vmem:[%s666_s23 + $0x130] sm:$0xff]  ;;  %v268_v40 = vld [vmem:[%s666_s23 + $0x2e8] sm:$0xff] }
  0x28   : > { %580 = vmatprep.subr.bf16.mxu0 %v579_v11  ;;  %v270_v41 = vld [vmem:[%s666_s23 + $0x2f8] sm:$0xff]  ;;  %v216_v42 = vld [vmem:[%s666_s23 + $0x148] sm:$0xff]  ;;  %v589_v44 = vpack.c.bf16 %v265_v37, %v263_v36  ;;  %v537_v45 = vpack.c.bf16 %v213_v39, %v211_v34  ;;  %v215_v46 = vld [vmem:[%s666_s23 + $0x140] sm:$0xff] }
  0x29   : > { %522 = vmatpush1.bf16.msra.mxu1 %v521_v61  ;;  %v218_v43 = vld [vmem:[%s666_s23 + $0x158] sm:$0xff]  ;;  %v591_v47 = vpack.c.bf16 %v270_v41, %v268_v40  ;;  %v267_v48 = vld [vmem:[%s666_s23 + $0x2e0] sm:$0xff]  ;;  %v269_v49 = vld [vmem:[%s666_s23 + $0x2f0] sm:$0xff] }
  0x2a   : > { %524 = vmatprep.subr.bf16.mxu1 %v523_v2  ;;  %v539_v50 = vpack.c.bf16 %v218_v43, %v216_v42  ;;  %v217_v51 = vld [vmem:[%s666_s23 + $0x150] sm:$0xff]  ;;  %v272_v52 = vld [vmem:[%s666_s23 + $0x308] sm:$0xff]  ;;  %v274_v53 = vld [vmem:[%s666_s23 + $0x318] sm:$0xff]  ;;  %v593_v56 = vpack.c.bf16 %v269_v49, %v267_v48 }
  0x2b   : > { %582 = vmatpush1.bf16.msra.mxu0 %v581_v20  ;;  %v220_v54 = vld [vmem:[%s666_s23 + $0x168] sm:$0xff]  ;;  %v222_v55 = vld [vmem:[%s666_s23 + $0x178] sm:$0xff]  ;;  %v541_v57 = vpack.c.bf16 %v217_v51, %v215_v46  ;;  %v595_v58 = vpack.c.bf16 %v274_v53, %v272_v52  ;;  %v271_v59 = vld [vmem:[%s666_s23 + $0x300] sm:$0xff] }
  0x2c   : > { %584 = vmatprep.subr.bf16.mxu0 %v583_v23  ;;  %v273_v60 = vld [vmem:[%s666_s23 + $0x310] sm:$0xff]  ;;  %v543_v61 = vpack.c.bf16 %v222_v55, %v220_v54  ;;  %v219_v62 = vld [vmem:[%s666_s23 + $0x160] sm:$0xff]  ;;  %v224_v0 = vld [vmem:[%s666_s23 + $0x188] sm:$0xff] }
  0x2d   : > { %526 = vmatpush1.bf16.msra.mxu1 %v525_v9  ;;  %v221_v63 = vld [vmem:[%s666_s23 + $0x170] sm:$0xff]  ;;  %v226_v1 = vld [vmem:[%s666_s23 + $0x198] sm:$0xff]  ;;  %v597_v2 = vpack.c.bf16 %v273_v60, %v271_v59  ;;  %v223_v5 = vld [vmem:[%s666_s23 + $0x180] sm:$0xff] }
  0x2e   : > { %528 = vmatprep.subr.bf16.mxu1 %v527_v14  ;;  %v545_v3 = vpack.c.bf16 %v221_v63, %v219_v62  ;;  %v547_v4 = vpack.c.bf16 %v226_v1, %v224_v0  ;;  %v225_v6 = vld [vmem:[%s666_s23 + $0x190] sm:$0xff]  ;;  %v228_v7 = vld [vmem:[%s666_s23 + $0x1a8] sm:$0xff]  ;;  %v230_v8 = vld [vmem:[%s666_s23 + $0x1b8] sm:$0xff] }
  0x2f   : > { %586 = vmatpush1.bf16.msra.mxu0 %v585_v32  ;;  %v173_v9 = vld [vmem:[%s782_s1 + $0x10] sm:$0xff]  ;;  %v549_v10 = vpack.c.bf16 %v225_v6, %v223_v5  ;;  %v551_v11 = vpack.c.bf16 %v230_v8, %v228_v7  ;;  %v227_v12 = vld [vmem:[%s666_s23 + $0x1a0] sm:$0xff]  ;;  %v232_v14 = vld [vmem:[%s666_s23 + $0x1c8] sm:$0xff] }
  0x30   : > { %588 = vmatprep.subr.bf16.mxu0 %v587_v35  ;;  %v229_v13 = vld [vmem:[%s666_s23 + $0x1b0] sm:$0xff]  ;;  %v234_v15 = vld [vmem:[%s666_s23 + $0x1d8] sm:$0xff]  ;;  %v231_v18 = vld [vmem:[%s666_s23 + $0x1c0] sm:$0xff] }
  0x31   : > { %530 = vmatpush1.bf16.msra.mxu1 %v529_v21  ;;  %v553_v16 = vpack.c.bf16 %v229_v13, %v227_v12  ;;  %v555_v17 = vpack.c.bf16 %v234_v15, %v232_v14  ;;  %v233_v19 = vld [vmem:[%s666_s23 + $0x1d0] sm:$0xff]  ;;  %v236_v20 = vld [vmem:[%s666_s23 + $0x1e8] sm:$0xff]  ;;  %v238_v21 = vld [vmem:[%s666_s23 + $0x1f8] sm:$0xff] }
  0x32   : > { %532 = vmatprep.subr.bf16.mxu1 %v531_v26  ;;  %v557_v22 = vpack.c.bf16 %v233_v19, %v231_v18  ;;  %v559_v23 = vpack.c.bf16 %v238_v21, %v236_v20  ;;  %v235_v24 = vld [vmem:[%s666_s23 + $0x1e0] sm:$0xff]  ;;  %v237_v25 = vld [vmem:[%s666_s23 + $0x1f0] sm:$0xff] }
  0x33   : > { %590 = vmatpush1.bf16.msra.mxu0 %v589_v44  ;;  %v561_v26 = vpack.c.bf16 %v237_v25, %v235_v24  ;;  %v171_v27 = vld [vmem:[%s782_s1] sm:$0xff] }
  0x34   : > { %592 = vmatprep.subr.bf16.mxu0 %v591_v47 }
  0x35   : > { %534 = vmatpush1.bf16.msra.mxu1 %v533_v33 }
  0x36   : > { %536 = vmatprep.subr.bf16.mxu1 %v535_v38 }
  0x37   : > { %594 = vmatpush1.bf16.msra.mxu0 %v593_v56 }
  0x38   : > { %596 = vmatprep.subr.bf16.mxu0 %v595_v58 }
  0x39   : > { %538 = vmatpush1.bf16.msra.mxu1 %v537_v45 }
  0x3a   : > { %540 = vmatprep.subr.bf16.mxu1 %v539_v50 }
  0x3b   : > { %598 = vmatpush1.bf16.msra.mxu0 %v597_v2 }
  0x3d   : > { %542 = vmatpush1.bf16.msra.mxu1 %v541_v57 }
  0x3e   : > { %544 = vmatprep.subr.bf16.mxu1 %v543_v61  ;;  %421 = vmatmul.mubr.f32.vlgmr.msra.gmra.mrb[0].mxu0 %v173_v9 }
  0x41   : > { %546 = vmatpush1.bf16.msra.mxu1 %v545_v3 }
  0x42   : > { %548 = vmatprep.subr.bf16.mxu1 %v547_v4 }
  0x45   : > { %550 = vmatpush1.bf16.msra.mxu1 %v549_v10 }
  0x46   : > { %552 = vmatprep.subr.bf16.mxu1 %v551_v11 }
  0x49   : > { %554 = vmatpush1.bf16.msra.mxu1 %v553_v16 }
  0x4a   : > { %556 = vmatprep.subr.bf16.mxu1 %v555_v17 }
  0x4d   : > { %558 = vmatpush1.bf16.msra.mxu1 %v557_v22 }
  0x4e   : > { %560 = vmatprep.subr.bf16.mxu1 %v559_v23 }
  0x51   : > { %562 = vmatpush1.bf16.msra.mxu1 %v561_v26 }
  0x54   : > { %350 = vmatmul.mubr.f32.vlgmr.msra.gmra.mrb[0].mxu1 %v171_v27 }
  0x87   : > { %v279_v30 = vpop.permute.xlu0 %278 }
 0x111   : > { %v422_v28 = vpop.f32.mrb[0].mxu0 }
 0x112   : > { %v424_v29 = vpop.f32.mrb[1].mxu0 }
 0x127   : > { %v351_v31 = vpop.f32.mrb[0].mxu1 }
 0x128   : > { %v352_v32 = vadd.f32 %v351_v31, %v279_v30  ;;  %v353_v33 = vpop.f32.mrb[1].mxu1 }
 0x129   : > { %v354_v34 = vadd.f32 %v353_v33, %v279_v30 }
 0x12a   : > { %v423_v35 = vadd.f32 %v422_v28, %v352_v32 }
 0x12b   : > { %v425_v36 = vadd.f32 %v424_v29, %v354_v34 }
 0x12c   : > { %v427_v37 = vmax.f32 %v423_v35, 0.0 }
 0x12d   : > { %v428_v38 = vmax.f32 %v425_v36, 0.0 }
 0x12e   : > { %429 = vst [vmem:[%s170_s4] sm:$0xff] %v427_v37 }
 0x12f   : > { %431 = vst.msk [vmem:[%s170_s4 + $0x8] sm:$0xff] %vm430_vm1, %v428_v38 }
 0x130 PF: > { %s13_s12 = sadd.s32 1, %s620_s12  }
 0x131   : > { %p10_p4 = scmp.ge.s32.totalorder %s13_s12, 4  }
 0x133   :  { %12 = sbr.rel (!%p10_p4) target bundleno = 1 (0x1), region = 62 }

// kernel: convae_forward.13
= control target key start
LH: loop header
LB: loop body
LE: loop exit
PB: predicated region body
PF: predicated region fallthrough
CT: control target
= control target key end

     0   :  { %s742_s14 = smov 0   ;;  %s804_s0 = inlined_call_operand.vmem [shape: f32[2,32,784], index: 0, kind: input, shape index: {}]   ;;  %s805_s1 = inlined_call_operand.vmem [shape: f32[1,32], index: 1, kind: input, shape index: {}]   ;;  %s806_s2 = inlined_call_operand.<no memory space> [shape: f32[1,1], index: 2, kind: input, shape index: {}]   ;;  %s807_s3 = inlined_call_operand.vmem [shape: f32[2,1,784], index: 3, kind: output, shape index: {}]  }
   0x1   :  { %v8_v0 = vstv %s806_s2 }
   0x2   :  { %9 = vst [vmem:[#allocation2] sm:$0x1] %v8_v0 }
   0x3 LB: > { %s618_s15 = sadd.s32 4294967295, %s712_s14   ;;  %p622_p0 = scmp.ge.s32.totalorder %s712_s14, 1  ;;  %s712_s14 = sphi %s742_s14, %s15_s14  }
   0x4   : > { %p139_p1 = scmp.lt.s32.totalorder %s712_s14, 3 }
   0x6   : > { %p140_p2 = pnand %p622_p0, %p139_p1 }
   0x7   : > { %p162_p3 = scmp.lt.s32.totalorder (!%p140_p2), %s618_s15, 1  ;;  %v714_v1 = vmov (!%p140_p2), 0.0   ;;  %v715_v3 = vmov (!%p140_p2), 0   ;;  %v171_v37 = vld [vmem:[%s805_s1] sm:$0x1] (!%p140_p2)  ;;  %vm210_vm0 = vcmask (!%p140_p2), 261120   ;;  %v206_v48 = vlaneseq (!%p140_p2) }
   0x8   : > { %143 = sbr.rel (%p140_p2) target bundleno = 275 (0x113), region = 32  ;;  %278 = vmatprep.mubr.f32.mxu0 (!%p140_p2), %v714_v1  ;;  %349 = vmatprep.mubr.f32.mxu1 (!%p140_p2), %v714_v1  ;;  %v716_v43 = vmov (!%p140_p2), 0.0|0.0   ;;  %vm717_vm1 = vmmov (!%p140_p2), 0   ;;  %v718_v61 = vmov (!%p140_p2), 1966171168  }
   0x9   : > { %v200_v2 = vld [vmem:[#allocation2] sm:$0x1] (!%p140_p2)  ;;  %691 = vset.pattern.permute.xlu0 (!%p140_p2), %v715_v3  ;;  %v207_v49 = vshrl.u32 (!%p140_p2), %v206_v48, 7  ;;  %v515_v62 = vunpack.c.l.s4 (!%p140_p2), %v718_v61  ;;  %vm562_vm2 = vcmp.lt.s32.totalorder (!%p140_p2), %v206_v48, 784 }
   0xa   : > { %203 = vperm.xlu0 (!%p140_p2), %691, %v200_v2  }
   0xb   : > { %v208_v50 = vsub.s32 (!%p140_p2), 0, %v207_v49  ;;  %v516_v3 = vunpack.c.0.s8 (!%p140_p2), %v515_v62 }
   0xf   : > { %s809_s15 = smov (!%p162_p3, %s618_s15), 1 }
  0x10   : > { %s676_s2 = smul.u32 224, %s809_s15 }
  0x11   : > { %s677_s21 = smul.u32 7, %s809_s15 }
  0x12   : > { %s758_s18 = scalar_lea.vmem %s804_s0, %s676_s2 }
  0x13   : > { %v173_v4 = vld [vmem:[%s758_s18 + $0x8] sm:$0xff]  ;;  %v180_v5 = vld [vmem:[%s758_s18 + $0x40] sm:$0xff]  ;;  %v175_v6 = vld [vmem:[%s758_s18 + $0x18] sm:$0xff]  ;;  %s170_s24 = scalar_lea.vmem %s807_s3, %s677_s21 }
  0x14   : > { %v646_v7 = vpack.c.bf16 %v180_v5, %v173_v4  ;;  %v182_v8 = vld [vmem:[%s758_s18 + $0x50] sm:$0xff]  ;;  %v172_v9 = vld [vmem:[%s758_s18] sm:$0xff]  ;;  %v179_v10 = vld [vmem:[%s758_s18 + $0x38] sm:$0xff] }
  0x15   : > { %v654_v11 = vpack.c.bf16 %v182_v8, %v175_v6  ;;  %v648_v12 = vpack.c.bf16 %v179_v10, %v172_v9  ;;  %v174_v13 = vld [vmem:[%s758_s18 + $0x10] sm:$0xff]  ;;  %v181_v14 = vld [vmem:[%s758_s18 + $0x48] sm:$0xff]  ;;  %v187_v15 = vld [vmem:[%s758_s18 + $0x78] sm:$0xff]  ;;  %v519_v9 = vsub.s32 %v516_v3, %v207_v49 }
  0x16   : > { %647 = vmatprep.subr.bf16.mxu0 %v646_v7  ;;  %v656_v16 = vpack.c.bf16 %v181_v14, %v174_v13  ;;  %v194_v17 = vld [vmem:[%s758_s18 + $0xb0] sm:$0xff]  ;;  %v189_v18 = vld [vmem:[%s758_s18 + $0x88] sm:$0xff]  ;;  %v196_v19 = vld [vmem:[%s758_s18 + $0xc0] sm:$0xff] }
  0x17   : > { %655 = vmatprep.subr.bf16.mxu1 %v654_v11  ;;  %649 = vmatpush1.bf16.msra.mxu0 %v648_v12  ;;  %v650_v20 = vpack.c.bf16 %v194_v17, %v187_v15  ;;  %v658_v21 = vpack.c.bf16 %v196_v19, %v189_v18  ;;  %v186_v22 = vld [vmem:[%s758_s18 + $0x70] sm:$0xff]  ;;  %v193_v23 = vld [vmem:[%s758_s18 + $0xa8] sm:$0xff]  ;;  %v188_v24 = vld [vmem:[%s758_s18 + $0x80] sm:$0xff] }
  0x18   : > { %657 = vmatpush1.bf16.msra.mxu1 %v656_v16  ;;  %v652_v25 = vpack.c.bf16 %v193_v23, %v186_v22  ;;  %v195_v26 = vld [vmem:[%s758_s18 + $0xb8] sm:$0xff]  ;;  %v177_v27 = vld [vmem:[%s758_s18 + $0x28] sm:$0xff]  ;;  %v184_v28 = vld [vmem:[%s758_s18 + $0x60] sm:$0xff] }
  0x19   : > { %651 = vmatprep.subr.bf16.mxu0 %v650_v20  ;;  %659 = vmatprep.subr.bf16.mxu1 %v658_v21  ;;  %v660_v29 = vpack.c.bf16 %v195_v26, %v188_v24  ;;  %v662_v30 = vpack.c.bf16 %v184_v28, %v177_v27  ;;  %v176_v31 = vld [vmem:[%s758_s18 + $0x20] sm:$0xff]  ;;  %v183_v32 = vld [vmem:[%s758_s18 + $0x58] sm:$0xff]  ;;  %v178_v33 = vld [vmem:[%s758_s18 + $0x30] sm:$0xff] }
  0x1a   : > { %v185_v34 = vld [vmem:[%s758_s18 + $0x68] sm:$0xff]  ;;  %v191_v35 = vld [vmem:[%s758_s18 + $0x98] sm:$0xff]  ;;  %v198_v36 = vld [vmem:[%s758_s18 + $0xd0] sm:$0xff]  ;;  %v664_v38 = vpack.c.bf16 %v183_v32, %v176_v31 }
  0x1b   : > { %653 = vmatpush1.bf16.msra.mxu0 %v652_v25  ;;  %v671_v39 = vpack.c.bf16 %v185_v34, %v178_v33  ;;  %v666_v40 = vpack.c.bf16 %v198_v36, %v191_v35  ;;  %v190_v41 = vld [vmem:[%s758_s18 + $0x90] sm:$0xff]  ;;  %v197_v42 = vld [vmem:[%s758_s18 + $0xc8] sm:$0xff]  ;;  %v192_v44 = vld [vmem:[%s758_s18 + $0xa0] sm:$0xff] }
  0x1c   : > { %661 = vmatpush1.bf16.msra.mxu1 %v660_v29  ;;  %663 = vmatprep.subr.bf16.mxu0 %v662_v30  ;;  %v199_v45 = vld [vmem:[%s758_s18 + $0xd8] sm:$0xff]  ;;  %v668_v46 = vpack.c.bf16 %v197_v42, %v190_v41 }
  0x1d   : > { %670 = vmatprep.subr.bf16.mxu1 %v716_v43  ;;  %v674_v47 = vpack.c.bf16 %v199_v45, %v192_v44 }
  0x1e   : > { %624 = vmatmul.mubr.msk.f32.vlgmr.msra.gmra.mrb[0].mxu0 %vm210_vm0, %v171_v37 }
  0x1f   : > { %625 = vmatmul.mubr.msk.f32.vlgmr.msra.gmra.mrb[0].mxu1 %vm210_vm0, %v171_v37  ;;  %665 = vmatpush1.bf16.msra.mxu0 %v664_v38 }
  0x20   : > { %672 = vmatpush3.bf16.msra.mxu1 %v671_v39  ;;  %667 = vmatprep.subr.bf16.mxu0 %v666_v40 }
  0x21   : > { %673 = vmatprep.subr.bf16.mxu1 %v716_v43  ;;  %420 = vmatprep.mubr.f32.mxu0 %v714_v1 }
  0x22   : > { %643 = vmatprep.mubr.msk.f32.mxu1 %vm717_vm1, %v714_v1 }
  0x23   : > { %669 = vmatpush1.bf16.msra.mxu0 %v668_v46 }
  0x24   : > { %675 = vmatpush3.bf16.msra.mxu1 %v674_v47 }
  0x26   : > { %626 = vmatmul.mubr.msk.f32.vlgmr.msra.gmra.mrb[2].mxu0 %vm210_vm0, %v171_v37 }
  0x27   : > { %644 = vmatmul.mubr.msk.f32.vlgmr.msra.gmra.mrb[2].mxu1 %vm210_vm0, %v171_v37 }
  0x89   : > { %v204_v51 = vpop.permute.xlu0 %203 }
  0x8a   : > { %v209_v52 = vrot.slane %v204_v51, %v208_v50 }
  0xf1   : > { %v280_v53 = vpop.f32.mrb[0].mxu0 }
  0xf2   : > { %v281_v54 = vadd.f32 %v280_v53, %v209_v52  ;;  %v351_v55 = vpop.f32.mrb[0].mxu1  ;;  %v282_v56 = vpop.f32.mrb[1].mxu0 }
  0xf3   : > { %v352_v57 = vadd.f32 %v351_v55, %v209_v52  ;;  %v283_v58 = vadd.f32 %v282_v56, %v209_v52  ;;  %v353_v59 = vpop.f32.mrb[1].mxu1 }
  0xf4   : > { %692 = vtanh.f32 %v281_v54  ;;  %v354_v60 = vadd.f32 %v353_v59, %v209_v52 }
  0xf5   : > { %694 = vtanh.f32 %v352_v57 }
  0xf6   : > { %696 = vtanh.f32 %v283_v58 }
  0xf7   : > { %698 = vtanh.f32 %v354_v60 }
  0xf9   : > { %v422_v63 = vpop.f32.mrb[2].mxu0 }
  0xfa   : > { %v423_v0 = vadd.f32 %v422_v63, %v209_v52  ;;  %v424_v1 = vpop.f32.mrb[3].mxu0  ;;  %v493_v2 = vpop.f32.mrb[2].mxu1 }
  0xfb   : > { %v425_v4 = vadd.f32 %v424_v1, %v209_v52  ;;  %v494_v5 = vadd.f32 %v493_v2, %v209_v52  ;;  %v645_v6 = vpop.f32.mrb[3].mxu1 }
  0xfc   : > { %700 = vtanh.f32 %v423_v0 }
  0xfd   : > { %702 = vtanh.f32 %v425_v4 }
  0xfe   : > { %v693_v7 = vpop.eup %692  ;;  %704 = vtanh.f32 %v494_v5 }
  0xff   : > { %v695_v8 = vpop.eup %694 }
 0x100   : > { %v697_v10 = vpop.eup %696 }
 0x101   : > { %v699_v11 = vpop.eup %698  ;;  %v511_v12 = vcombine.low %v693_v7, %v697_v10 }
 0x102   : > { %v512_v13 = vcombine.low %v695_v8, %v699_v11 }
 0x103   : > { %v520_v14 = vrot.slane %v511_v12, %v519_v9 }
 0x104   : > { %v527_v15 = vrot.slane %v512_v13, %v519_v9 }
 0x106   : > { %v701_v16 = vpop.eup %700  ;;  %v542_v17 = vcombine.low %v520_v14, %v527_v15 }
 0x107   : > { %v703_v18 = vpop.eup %702 }
 0x108   : > { %v705_v19 = vpop.eup %704  ;;  %v513_v20 = vcombine.low %v701_v16, %v703_v18  ;;  %v550_v24 = vrot.slane %v542_v17, %v519_v9 }
 0x109   : > { %v541_v22 = vrot.slane %v705_v19, %v519_v9 }
 0x10a   : > { %v534_v21 = vrot.slane %v513_v20, %v519_v9 }
 0x10c   : > { %v543_v23 = vcombine.low %v534_v21, %v541_v22 }
 0x10e   : > { %v557_v25 = vrot.slane %v543_v23, %v519_v9 }
 0x110   : > { %v558_v26 = vcombine.low %v550_v24, %v557_v25 }
 0x112   : > { %564 = vst.msk [vmem:[%s170_s24] sm:$0x7f] %vm562_vm2, %v558_v26 }
 0x113 PF: > { %s15_s14 = sadd.s32 1, %s712_s14  }
 0x114   : > { %p12_p4 = scmp.ge.s32.totalorder %s15_s14, 4  }
 0x116   :  { %14 = sbr.rel (!%p12_p4) target bundleno = 3 (0x3), region = 62 }

</bundles_post_ra>
